<compile_context>
chip_gen: v7x
topology: tpu7x:2x2x1
jax: 0.10.0
libtpu: 0.0.40
codegen_flags: <defaults>
</compile_context>

<pallas_src>
import numpy as np
import jax
import jax.numpy as jnp
from jax.experimental import pallas as pl
from jax.experimental.pallas import tpu as pltpu

EPS_VN = 1e-6      # EPS used in vn_layers
EPS_BN = 1e-5      # nn.BatchNorm1d default eps
NEG_SLOPE = 0.2
C_IN, C1, C2 = 1024, 256, 128


def _regressor_kernel(x_ref, g_ref,
                      w1_ref, wd1_ref, gam1_ref, b1_ref,
                      w2_ref, wd2_ref, gam2_ref, b2_ref,
                      wrot_ref, wtr_ref, btr_ref,
                      rot_ref, trans_ref):
    BT = x_ref.shape[0]          # B * 3 rows, one per (batch, xyz component)
    B = BT // 3

    x = x_ref[...]               # [B*3, 1024] bf16
    G = g_ref[...]               # [B*3, B*3] f32, precomputed block-diag of ones

    def bn_train(h, gamma, beta):
        # training-mode BatchNorm1d, one-pass stats: var = E[h^2] - E[h]^2 (f32).
        mean = jnp.mean(h, axis=0, keepdims=True)
        msq = jnp.mean(h * h, axis=0, keepdims=True)
        var = msq - mean * mean
        return (h - mean) * jax.lax.rsqrt(var + EPS_BN) * gamma + beta

    def vn_leaky_relu(h, d):
        # out = h - (1-neg) * [dot<0] * (dot / (|d|^2 + eps)) * d
        # One fused group-sum matmul:  G @ [h*d | d*d]  reduces over the xyz rows
        # of each batch element AND broadcasts the sums back to its 3 rows.
        C = h.shape[1]
        red = jnp.dot(G, jnp.concatenate([h * d, d * d], axis=-1),
                      preferred_element_type=jnp.float32)            # [BT, 2C]
        dot = red[:, :C]
        dns = red[:, C:]
        coef = jnp.where(dot < 0.0,
                         dot * pl.reciprocal(dns + EPS_VN, approx=True),
                         0.0)
        return h - (1.0 - NEG_SLOPE) * coef * d

    # ---- block 1: VNLinear(1024,256) + BatchNorm1d(256) + VNLeakyReLU ----
    h1 = jnp.dot(x, w1_ref[...], preferred_element_type=jnp.float32)        # [BT,256]
    h1 = bn_train(h1, gam1_ref[...], b1_ref[...])
    d1 = jnp.dot(h1.astype(jnp.bfloat16), wd1_ref[...],
                 preferred_element_type=jnp.float32)
    h1 = vn_leaky_relu(h1, d1)

    # ---- block 2: VNLinear(256,128) + BatchNorm1d(128) + VNLeakyReLU ----
    h2 = jnp.dot(h1.astype(jnp.bfloat16), w2_ref[...],
                 preferred_element_type=jnp.float32)                        # [BT,128]
    h2 = bn_train(h2, gam2_ref[...], b2_ref[...])
    d2 = jnp.dot(h2.astype(jnp.bfloat16), wd2_ref[...],
                 preferred_element_type=jnp.float32)
    f = vn_leaky_relu(h2, d2)                                               # [BT,128] f32
    f_bf = f.astype(jnp.bfloat16)

    # ---- rot head: VNLinear(128,2) + L2 normalize over the 2 channels ----
    rot = jnp.dot(f_bf, wrot_ref[...], preferred_element_type=jnp.float32)  # [BT, 2]
    # NOTE: faithful to torch.norm (no epsilon) -> near-zero pre-norm gives NaN,
    # exactly like the PyTorch module.
    rot = rot * jax.lax.rsqrt(jnp.sum(rot * rot, axis=1, keepdims=True))
    rot_ref[...] = rot                                                      # one store

    # ---- trans head: Linear(128*3, 3) ----
    # f rows are ordered (b, d); flatten yields cols (d*128 + c), matching the
    # weight permutation done once in prepare_params().
    f_flat = f.reshape(B, 3 * C2).astype(jnp.bfloat16)                      # [B, 384]
    trans_ref[...] = (jnp.dot(f_flat, wtr_ref[...],
                              preferred_element_type=jnp.float32)
                      + btr_ref[...])                                       # [B, 3]


def prepare_params(params):
    """One-time weight re-layout + bf16 cast (call outside the jitted forward)."""
    bf = jnp.bfloat16
    # W_trans[j, c*3+d]  ->  Wk[d*128+c, j]
    wtr_k = (params["w_trans"].reshape(3, C2, 3)   # [j, c, d]
             .transpose(0, 2, 1)                   # [j, d, c]
             .reshape(3, 3 * C2).T)                # [d*128+c, j]
    return (
        params["w1"].T.astype(bf),                 # [1024, 256]
        params["wd1"].T.astype(bf),                # [256, 256]
        params["g1"].astype(jnp.float32),          # [1, 256]
        params["b1"].astype(jnp.float32),          # [1, 256]
        params["w2"].T.astype(bf),                 # [256, 128]
        params["wd2"].T.astype(bf),                # [128, 128]
        params["g2"].astype(jnp.float32),          # [1, 128]
        params["b2"].astype(jnp.float32),          # [1, 128]
        params["w_rot"].T.astype(bf),              # [128, 2]
        wtr_k.astype(bf),                          # [384, 3]
        params["b_trans"].astype(jnp.float32),     # [1, 3]
    )


def _cost_estimate(B):
    """Advisory cost hint so XLA schedules around the custom call correctly."""
    BT = 3 * B
    flops = (2 * BT * (C_IN * C1 + C1 * C1 + C1 * C2 + C2 * C2 + 2 * C2)   # dense matmuls
             + 2 * BT * BT * 2 * (C1 + C2)                                 # fused group sums
             + 2 * B * 3 * (3 * C2))                                       # trans head
    transcendentals = BT * (C1 + C2 + 1) + C1 + C2                         # rcp + rsqrt
    weight_bytes = (2 * (C_IN * C1 + C1 * C1 + C1 * C2 + C2 * C2 + 2 * C2 + 3 * 3 * C2)
                    + 4 * (2 * C1 + 2 * C2 + 3))
    bytes_accessed = (weight_bytes
                      + 2 * BT * C_IN          # x (bf16)
                      + 4 * BT * BT            # G (f32)
                      + 4 * (2 * BT + 3 * B))  # outputs (f32)
    return pl.CostEstimate(flops=int(flops),
                           transcendentals=int(transcendentals),
                           bytes_accessed=int(bytes_accessed))


@jax.jit
def vn_regressor_6d(x, kparams):
    """x: [B, 1024, 3] float32 (PyTorch layout). Returns (rot [B,2,3], trans [B,3,1])."""
    B = x.shape[0]
    BT = 3 * B
    # Single fused layout op: [B,1024,3] -> [B*3,1024], rows ordered (b, d), bf16.
    # (A hot caller should produce x in this layout upstream to drop this pass.)
    xk = jnp.transpose(x, (0, 2, 1)).reshape(BT, C_IN).astype(jnp.bfloat16)

    # Block-diagonal group-sum matrix (3x3 ones blocks), built at trace time
    # from the static batch size -> a compile-time constant, no in-kernel setup.
    G = jnp.asarray(np.kron(np.eye(B, dtype=np.float32),
                            np.ones((3, 3), np.float32)))                  # [BT, BT]

    vmem = pl.BlockSpec(memory_space=pltpu.MemorySpace.VMEM)
    rot, trans = pl.pallas_call(
        _regressor_kernel,
        in_specs=[vmem] * 13,
        out_specs=(vmem, vmem),
        out_shape=(jax.ShapeDtypeStruct((BT, 2), jnp.float32),
                   jax.ShapeDtypeStruct((B, 3), jnp.float32)),
        cost_estimate=_cost_estimate(B),
    )(xk, G, *kparams)

    rot = rot.reshape(B, 3, 2).transpose(0, 2, 1)   # [B, 2, 3] (trivial XLA relayout)
    return rot, trans[:, :, None]                   # trailing unit dim: free reshape


# ------------------------- pure-JAX f32 reference ----------------------------
def _reference(x, params):
    # x: [B, 1024, 3]
    def vnlinear(h, w):          # h: [B, C, 3]
        return jnp.einsum("oc,bcd->bod", w, h)

    def bn(h, g, b):             # training-mode batch stats
        mean = jnp.mean(h, axis=(0, 2), keepdims=True)
        var = jnp.mean((h - mean) ** 2, axis=(0, 2), keepdims=True)
        return (h - mean) * jax.lax.rsqrt(var + EPS_BN) * g[None, :, None] + b[None, :, None]

    def vnlrelu(h, wd):
        d = vnlinear(h, wd)
        dot = jnp.sum(h * d, axis=2, keepdims=True)
        dns = jnp.sum(d * d, axis=2, keepdims=True)
        mask = (dot >= 0).astype(jnp.float32)
        return NEG_SLOPE * h + (1 - NEG_SLOPE) * (
            mask * h + (1 - mask) * (h - (dot / (dns + EPS_VN)) * d))

    h = vnlinear(x, params["w1"])
    h = bn(h, params["g1"][0], params["b1"][0])
    h = vnlrelu(h, params["wd1"])
    h = vnlinear(h, params["w2"])
    h = bn(h, params["g2"][0], params["b2"][0])
    f = vnlrelu(h, params["wd2"])                          # [B, 128, 3]
    rot_pre = vnlinear(f, params["w_rot"])                 # [B, 2, 3]
    rot = rot_pre / jnp.linalg.norm(rot_pre, axis=1, keepdims=True)
    trans = f.reshape(f.shape[0], C2 * 3) @ params["w_trans"].T + params["b_trans"][0]
    return rot, trans[:, :, None], rot_pre


if __name__ == "__main__":
    key = jax.random.PRNGKey(0)
    ks = jax.random.split(key, 8)
    B = 2

    params = {
        "w1":      0.02 * jax.random.normal(ks[0], (C1, C_IN), jnp.float32),
        "wd1":     0.05 * jax.random.normal(ks[1], (C1, C1), jnp.float32),
        "g1":      jnp.ones((1, C1), jnp.float32),
        "b1":      jnp.zeros((1, C1), jnp.float32),
        "w2":      0.05 * jax.random.normal(ks[2], (C2, C1), jnp.float32),
        "wd2":     0.05 * jax.random.normal(ks[3], (C2, C2), jnp.float32),
        "g2":      jnp.ones((1, C2), jnp.float32),
        "b2":      jnp.zeros((1, C2), jnp.float32),
        "w_rot":   0.05 * jax.random.normal(ks[4], (2, C2), jnp.float32),
        "w_trans": 0.05 * jax.random.normal(ks[5], (3, 3 * C2), jnp.float32),
        "b_trans": 0.01 * jax.random.normal(ks[6], (1, 3), jnp.float32),
    }
    x = jax.random.normal(ks[7], (B, C_IN, 3), jnp.float32)

    kparams = prepare_params(params)           # hoisted out of the jitted path
    rot, trans = vn_regressor_6d(x, kparams)
    jax.block_until_ready((rot, trans))

    rot_ref, trans_ref, rot_pre_ref = _reference(x, params)

    assert rot.shape == (B, 2, 3) and trans.shape == (B, 3, 1)

    # bf16 weights / MXU operands -> relaxed tolerances vs. the f32 reference.
    assert jnp.allclose(trans, trans_ref, atol=2e-2, rtol=2e-2), "trans mismatch"

    # rot is L2-normalized, which amplifies benign rounding when the pre-norm
    # vector is small; so check (a) unit norm, (b) agreement in the
    # well-conditioned pre-normalization scale.
    nrm_k = jnp.sqrt(jnp.sum(rot * rot, axis=1))
    assert jnp.allclose(nrm_k, jnp.ones_like(nrm_k), atol=5e-3), "rot not unit-norm"
    nrm_ref = jnp.linalg.norm(rot_pre_ref, axis=1, keepdims=True)   # [B,1,3]
    assert jnp.allclose(rot * nrm_ref, rot_pre_ref, atol=2e-2, rtol=2e-2), "rot mismatch"

    print("KERNEL_OK")
</pallas_src>

<mosaic_0001>
module attributes {stable_mosaic.version = 11 : i64} {
  func.func @_regressor_kernel(%arg0: memref<6x1024xbf16, #tpu.memory_space<vmem>>, %arg1: memref<6x6xf32, #tpu.memory_space<vmem>>, %arg2: memref<1024x256xbf16, #tpu.memory_space<vmem>>, %arg3: memref<256x256xbf16, #tpu.memory_space<vmem>>, %arg4: memref<1x256xf32, #tpu.memory_space<vmem>>, %arg5: memref<1x256xf32, #tpu.memory_space<vmem>>, %arg6: memref<256x128xbf16, #tpu.memory_space<vmem>>, %arg7: memref<128x128xbf16, #tpu.memory_space<vmem>>, %arg8: memref<1x128xf32, #tpu.memory_space<vmem>>, %arg9: memref<1x128xf32, #tpu.memory_space<vmem>>, %arg10: memref<128x2xbf16, #tpu.memory_space<vmem>>, %arg11: memref<384x3xbf16, #tpu.memory_space<vmem>>, %arg12: memref<1x3xf32, #tpu.memory_space<vmem>>, %arg13: memref<6x2xf32, #tpu.memory_space<vmem>>, %arg14: memref<2x3xf32, #tpu.memory_space<vmem>>) attributes {dimension_semantics = [], scalar_prefetch = 0 : i64, scratch_operands = 0 : i64, tpu.core_type = #tpu.core_type<tc>} {
    %c0 = arith.constant 0 : index
    %c0_0 = arith.constant 0 : index
    %0 = vector.load %arg0[%c0, %c0_0] : memref<6x1024xbf16, #tpu.memory_space<vmem>>, vector<6x1024xbf16>
    %c0_1 = arith.constant 0 : index
    %c0_2 = arith.constant 0 : index
    %1 = vector.load %arg1[%c0_1, %c0_2] : memref<6x6xf32, #tpu.memory_space<vmem>>, vector<6x6xf32>
    %c0_3 = arith.constant 0 : index
    %c0_4 = arith.constant 0 : index
    %2 = vector.load %arg2[%c0_3, %c0_4] : memref<1024x256xbf16, #tpu.memory_space<vmem>>, vector<1024x256xbf16>
    %cst = arith.constant dense<0.000000e+00> : vector<6x256xf32>
    %3 = tpu.matmul %0, %2, %cst {dimension_numbers = #tpu.dot_dimension_numbers<[1], [0], [0], [1], [0, 0, 1, 1], [], []>} : vector<6x1024xbf16>, vector<1024x256xbf16>, vector<6x256xf32> -> vector<6x256xf32>
    %c0_5 = arith.constant 0 : index
    %c0_6 = arith.constant 0 : index
    %4 = vector.load %arg4[%c0_5, %c0_6] : memref<1x256xf32, #tpu.memory_space<vmem>>, vector<1x256xf32>
    %c0_7 = arith.constant 0 : index
    %c0_8 = arith.constant 0 : index
    %5 = vector.load %arg5[%c0_7, %c0_8] : memref<1x256xf32, #tpu.memory_space<vmem>>, vector<1x256xf32>
    %cst_9 = arith.constant dense<0.000000e+00> : vector<256xf32>
    %6 = vector.multi_reduction <add>, %3, %cst_9 [0] : vector<6x256xf32> to vector<256xf32>
    %7 = vector.shape_cast %6 : vector<256xf32> to vector<1x256xf32>
    %cst_10 = arith.constant 6.000000e+00 : f32
    %8 = vector.broadcast %cst_10 : f32 to vector<1x256xf32>
    %9 = arith.divf %7, %8 : vector<1x256xf32>
    %10 = arith.mulf %3, %3 : vector<6x256xf32>
    %cst_11 = arith.constant dense<0.000000e+00> : vector<256xf32>
    %11 = vector.multi_reduction <add>, %10, %cst_11 [0] : vector<6x256xf32> to vector<256xf32>
    %12 = vector.shape_cast %11 : vector<256xf32> to vector<1x256xf32>
    %cst_12 = arith.constant 6.000000e+00 : f32
    %13 = vector.broadcast %cst_12 : f32 to vector<1x256xf32>
    %14 = arith.divf %12, %13 : vector<1x256xf32>
    %15 = arith.mulf %9, %9 : vector<1x256xf32>
    %16 = arith.subf %14, %15 : vector<1x256xf32>
    %17 = vector.broadcast %9 : vector<1x256xf32> to vector<6x256xf32>
    %18 = arith.subf %3, %17 : vector<6x256xf32>
    %cst_13 = arith.constant 9.99999974E-6 : f32
    %19 = vector.broadcast %cst_13 : f32 to vector<1x256xf32>
    %20 = arith.addf %16, %19 : vector<1x256xf32>
    %21 = math.rsqrt %20 : vector<1x256xf32>
    %22 = vector.broadcast %21 : vector<1x256xf32> to vector<6x256xf32>
    %23 = arith.mulf %18, %22 : vector<6x256xf32>
    %24 = vector.broadcast %4 : vector<1x256xf32> to vector<6x256xf32>
    %25 = arith.mulf %23, %24 : vector<6x256xf32>
    %26 = vector.broadcast %5 : vector<1x256xf32> to vector<6x256xf32>
    %27 = arith.addf %25, %26 : vector<6x256xf32>
    %28 = arith.truncf %27 : vector<6x256xf32> to vector<6x256xbf16>
    %c0_14 = arith.constant 0 : index
    %c0_15 = arith.constant 0 : index
    %29 = vector.load %arg3[%c0_14, %c0_15] : memref<256x256xbf16, #tpu.memory_space<vmem>>, vector<256x256xbf16>
    %cst_16 = arith.constant dense<0.000000e+00> : vector<6x256xf32>
    %30 = tpu.matmul %28, %29, %cst_16 {dimension_numbers = #tpu.dot_dimension_numbers<[1], [0], [0], [1], [0, 0, 1, 1], [], []>} : vector<6x256xbf16>, vector<256x256xbf16>, vector<6x256xf32> -> vector<6x256xf32>
    %31 = arith.mulf %27, %30 : vector<6x256xf32>
    %32 = arith.mulf %30, %30 : vector<6x256xf32>
    %33 = tpu.concatenate %31, %32 in 1 : vector<6x256xf32>, vector<6x256xf32> -> vector<6x512xf32>
    %cst_17 = arith.constant dense<0.000000e+00> : vector<6x512xf32>
    %34 = tpu.matmul %1, %33, %cst_17 {dimension_numbers = #tpu.dot_dimension_numbers<[1], [0], [0], [1], [0, 0, 1, 1], [], []>} : vector<6x6xf32>, vector<6x512xf32>, vector<6x512xf32> -> vector<6x512xf32>
    %35 = vector.extract_strided_slice %34 {offsets = [0, 0], sizes = [6, 256], strides = [1, 1]} : vector<6x512xf32> to vector<6x256xf32>
    %36 = vector.extract_strided_slice %34 {offsets = [0, 256], sizes = [6, 256], strides = [1, 1]} : vector<6x512xf32> to vector<6x256xf32>
    %cst_18 = arith.constant 0.000000e+00 : f32
    %37 = vector.broadcast %cst_18 : f32 to vector<6x256xf32>
    %38 = arith.cmpf olt, %35, %37 : vector<6x256xf32>
    %cst_19 = arith.constant 9.99999997E-7 : f32
    %39 = vector.broadcast %cst_19 : f32 to vector<6x256xf32>
    %40 = arith.addf %36, %39 : vector<6x256xf32>
    %41 = tpu.reciprocal %40 {approx = true} : vector<6x256xf32> -> vector<6x256xf32>
    %42 = arith.mulf %35, %41 : vector<6x256xf32>
    %cst_20 = arith.constant 0.000000e+00 : f32
    %43 = vector.broadcast %cst_20 : f32 to vector<6x256xf32>
    %44 = arith.select %38, %42, %43 : vector<6x256xi1>, vector<6x256xf32>
    %cst_21 = arith.constant 8.000000e-01 : f32
    %45 = vector.broadcast %cst_21 : f32 to vector<6x256xf32>
    %46 = arith.mulf %45, %44 : vector<6x256xf32>
    %47 = arith.mulf %46, %30 : vector<6x256xf32>
    %48 = arith.subf %27, %47 : vector<6x256xf32>
    %49 = arith.truncf %48 : vector<6x256xf32> to vector<6x256xbf16>
    %c0_22 = arith.constant 0 : index
    %c0_23 = arith.constant 0 : index
    %50 = vector.load %arg6[%c0_22, %c0_23] : memref<256x128xbf16, #tpu.memory_space<vmem>>, vector<256x128xbf16>
    %cst_24 = arith.constant dense<0.000000e+00> : vector<6x128xf32>
    %51 = tpu.matmul %49, %50, %cst_24 {dimension_numbers = #tpu.dot_dimension_numbers<[1], [0], [0], [1], [0, 0, 1, 1], [], []>} : vector<6x256xbf16>, vector<256x128xbf16>, vector<6x128xf32> -> vector<6x128xf32>
    %c0_25 = arith.constant 0 : index
    %c0_26 = arith.constant 0 : index
    %52 = vector.load %arg8[%c0_25, %c0_26] : memref<1x128xf32, #tpu.memory_space<vmem>>, vector<1x128xf32>
    %c0_27 = arith.constant 0 : index
    %c0_28 = arith.constant 0 : index
    %53 = vector.load %arg9[%c0_27, %c0_28] : memref<1x128xf32, #tpu.memory_space<vmem>>, vector<1x128xf32>
    %cst_29 = arith.constant dense<0.000000e+00> : vector<128xf32>
    %54 = vector.multi_reduction <add>, %51, %cst_29 [0] : vector<6x128xf32> to vector<128xf32>
    %55 = vector.shape_cast %54 : vector<128xf32> to vector<1x128xf32>
    %cst_30 = arith.constant 6.000000e+00 : f32
    %56 = vector.broadcast %cst_30 : f32 to vector<1x128xf32>
    %57 = arith.divf %55, %56 : vector<1x128xf32>
    %58 = arith.mulf %51, %51 : vector<6x128xf32>
    %cst_31 = arith.constant dense<0.000000e+00> : vector<128xf32>
    %59 = vector.multi_reduction <add>, %58, %cst_31 [0] : vector<6x128xf32> to vector<128xf32>
    %60 = vector.shape_cast %59 : vector<128xf32> to vector<1x128xf32>
    %cst_32 = arith.constant 6.000000e+00 : f32
    %61 = vector.broadcast %cst_32 : f32 to vector<1x128xf32>
    %62 = arith.divf %60, %61 : vector<1x128xf32>
    %63 = arith.mulf %57, %57 : vector<1x128xf32>
    %64 = arith.subf %62, %63 : vector<1x128xf32>
    %65 = vector.broadcast %57 : vector<1x128xf32> to vector<6x128xf32>
    %66 = arith.subf %51, %65 : vector<6x128xf32>
    %cst_33 = arith.constant 9.99999974E-6 : f32
    %67 = vector.broadcast %cst_33 : f32 to vector<1x128xf32>
    %68 = arith.addf %64, %67 : vector<1x128xf32>
    %69 = math.rsqrt %68 : vector<1x128xf32>
    %70 = vector.broadcast %69 : vector<1x128xf32> to vector<6x128xf32>
    %71 = arith.mulf %66, %70 : vector<6x128xf32>
    %72 = vector.broadcast %52 : vector<1x128xf32> to vector<6x128xf32>
    %73 = arith.mulf %71, %72 : vector<6x128xf32>
    %74 = vector.broadcast %53 : vector<1x128xf32> to vector<6x128xf32>
    %75 = arith.addf %73, %74 : vector<6x128xf32>
    %76 = arith.truncf %75 : vector<6x128xf32> to vector<6x128xbf16>
    %c0_34 = arith.constant 0 : index
    %c0_35 = arith.constant 0 : index
    %77 = vector.load %arg7[%c0_34, %c0_35] : memref<128x128xbf16, #tpu.memory_space<vmem>>, vector<128x128xbf16>
    %cst_36 = arith.constant dense<0.000000e+00> : vector<6x128xf32>
    %78 = tpu.matmul %76, %77, %cst_36 {dimension_numbers = #tpu.dot_dimension_numbers<[1], [0], [0], [1], [0, 0, 1, 1], [], []>} : vector<6x128xbf16>, vector<128x128xbf16>, vector<6x128xf32> -> vector<6x128xf32>
    %79 = arith.mulf %75, %78 : vector<6x128xf32>
    %80 = arith.mulf %78, %78 : vector<6x128xf32>
    %81 = tpu.concatenate %79, %80 in 1 : vector<6x128xf32>, vector<6x128xf32> -> vector<6x256xf32>
    %cst_37 = arith.constant dense<0.000000e+00> : vector<6x256xf32>
    %82 = tpu.matmul %1, %81, %cst_37 {dimension_numbers = #tpu.dot_dimension_numbers<[1], [0], [0], [1], [0, 0, 1, 1], [], []>} : vector<6x6xf32>, vector<6x256xf32>, vector<6x256xf32> -> vector<6x256xf32>
    %83 = vector.extract_strided_slice %82 {offsets = [0, 0], sizes = [6, 128], strides = [1, 1]} : vector<6x256xf32> to vector<6x128xf32>
    %84 = vector.extract_strided_slice %82 {offsets = [0, 128], sizes = [6, 128], strides = [1, 1]} : vector<6x256xf32> to vector<6x128xf32>
    %cst_38 = arith.constant 0.000000e+00 : f32
    %85 = vector.broadcast %cst_38 : f32 to vector<6x128xf32>
    %86 = arith.cmpf olt, %83, %85 : vector<6x128xf32>
    %cst_39 = arith.constant 9.99999997E-7 : f32
    %87 = vector.broadcast %cst_39 : f32 to vector<6x128xf32>
    %88 = arith.addf %84, %87 : vector<6x128xf32>
    %89 = tpu.reciprocal %88 {approx = true} : vector<6x128xf32> -> vector<6x128xf32>
    %90 = arith.mulf %83, %89 : vector<6x128xf32>
    %cst_40 = arith.constant 0.000000e+00 : f32
    %91 = vector.broadcast %cst_40 : f32 to vector<6x128xf32>
    %92 = arith.select %86, %90, %91 : vector<6x128xi1>, vector<6x128xf32>
    %cst_41 = arith.constant 8.000000e-01 : f32
    %93 = vector.broadcast %cst_41 : f32 to vector<6x128xf32>
    %94 = arith.mulf %93, %92 : vector<6x128xf32>
    %95 = arith.mulf %94, %78 : vector<6x128xf32>
    %96 = arith.subf %75, %95 : vector<6x128xf32>
    %97 = arith.truncf %96 : vector<6x128xf32> to vector<6x128xbf16>
    %c0_42 = arith.constant 0 : index
    %c0_43 = arith.constant 0 : index
    %98 = vector.load %arg10[%c0_42, %c0_43] : memref<128x2xbf16, #tpu.memory_space<vmem>>, vector<128x2xbf16>
    %cst_44 = arith.constant dense<0.000000e+00> : vector<6x2xf32>
    %99 = tpu.matmul %97, %98, %cst_44 {dimension_numbers = #tpu.dot_dimension_numbers<[1], [0], [0], [1], [0, 0, 1, 1], [], []>} : vector<6x128xbf16>, vector<128x2xbf16>, vector<6x2xf32> -> vector<6x2xf32>
    %100 = arith.mulf %99, %99 : vector<6x2xf32>
    %cst_45 = arith.constant dense<0.000000e+00> : vector<6xf32>
    %101 = vector.multi_reduction <add>, %100, %cst_45 [1] : vector<6x2xf32> to vector<6xf32>
    %102 = vector.shape_cast %101 : vector<6xf32> to vector<6x1xf32>
    %103 = math.rsqrt %102 : vector<6x1xf32>
    %104 = vector.broadcast %103 : vector<6x1xf32> to vector<6x2xf32>
    %105 = arith.mulf %99, %104 : vector<6x2xf32>
    %c0_46 = arith.constant 0 : index
    %c0_47 = arith.constant 0 : index
    %106 = vector.load %arg13[%c0_46, %c0_47] : memref<6x2xf32, #tpu.memory_space<vmem>>, vector<6x2xf32>
    tpu.vector_store %arg13[%c0_46, %c0_47], %105 {strides = array<i32>} : memref<6x2xf32, #tpu.memory_space<vmem>>, vector<6x2xf32>,
    %107 = vector.shape_cast %96 : vector<6x128xf32> to vector<2x384xf32>
    %108 = arith.truncf %107 : vector<2x384xf32> to vector<2x384xbf16>
    %c0_48 = arith.constant 0 : index
    %c0_49 = arith.constant 0 : index
    %109 = vector.load %arg11[%c0_48, %c0_49] : memref<384x3xbf16, #tpu.memory_space<vmem>>, vector<384x3xbf16>
    %cst_50 = arith.constant dense<0.000000e+00> : vector<2x3xf32>
    %110 = tpu.matmul %108, %109, %cst_50 {dimension_numbers = #tpu.dot_dimension_numbers<[1], [0], [0], [1], [0, 0, 1, 1], [], []>} : vector<2x384xbf16>, vector<384x3xbf16>, vector<2x3xf32> -> vector<2x3xf32>
    %c0_51 = arith.constant 0 : index
    %c0_52 = arith.constant 0 : index
    %111 = vector.load %arg12[%c0_51, %c0_52] : memref<1x3xf32, #tpu.memory_space<vmem>>, vector<1x3xf32>
    %112 = vector.broadcast %111 : vector<1x3xf32> to vector<2x3xf32>
    %113 = arith.addf %110, %112 : vector<2x3xf32>
    %c0_53 = arith.constant 0 : index
    %c0_54 = arith.constant 0 : index
    %114 = vector.load %arg14[%c0_53, %c0_54] : memref<2x3xf32, #tpu.memory_space<vmem>>, vector<2x3xf32>
    tpu.vector_store %arg14[%c0_53, %c0_54], %113 {strides = array<i32>} : memref<2x3xf32, #tpu.memory_space<vmem>>, vector<2x3xf32>,
    return
  }
}

</mosaic_0001>

<bundles_post_ra>
// kernel: vn_regressor_6d.1
= control target key start
LH: loop header
LB: loop body
LE: loop exit
PB: predicated region body
PF: predicated region fallthrough
CT: control target
= control target key end

     0   :  { %20 = vsyncpa [#allocation3], 0  ;;  %s3658_s0 = inlined_call_operand.vmem [shape: bf16[6,1024], index: 0, kind: input, shape index: {}]   ;;  %s3659_s1 = inlined_call_operand.vmem [shape: f32[6,6], index: 1, kind: input, shape index: {}]   ;;  %s3660_s2 = inlined_call_operand.hbm [shape: bf16[1024,256], index: 2, kind: input, shape index: {}]   ;;  %s3661_s3 = inlined_call_operand.vmem [shape: bf16[256,256], index: 3, kind: input, shape index: {}]   ;;  %s3662_s4 = inlined_call_operand.hbm [shape: f32[1,256], index: 4, kind: input, shape index: {}]   ;;  %s3663_s5 = inlined_call_operand.vmem [shape: f32[1,256], index: 5, kind: input, shape index: {}]   ;;  %s3664_s6 = inlined_call_operand.vmem [shape: bf16[256,128], index: 6, kind: input, shape index: {}]   ;;  %s3665_s7 = inlined_call_operand.vmem [shape: bf16[128,128], index: 7, kind: input, shape index: {}]   ;;  %s3666_s8 = inlined_call_operand.vmem [shape: f32[1,128], index: 8, kind: input, shape index: {}]   ;;  %s3667_s9 = inlined_call_operand.vmem [shape: f32[1,128], index: 9, kind: input, shape index: {}]   ;;  %s3668_s10 = inlined_call_operand.vmem [shape: bf16[128,2], index: 10, kind: input, shape index: {}]   ;;  %s3669_s11 = inlined_call_operand.vmem [shape: bf16[384,3], index: 11, kind: input, shape index: {}]   ;;  %s3670_s12 = inlined_call_operand.vmem [shape: f32[1,3], index: 12, kind: input, shape index: {}]   ;;  %s3671_s13 = inlined_call_operand.vmem [shape: f32[6,2], index: 13, kind: output, shape index: {0}]   ;;  %s3672_s14 = inlined_call_operand.hbm [shape: f32[2,3], index: 14, kind: output, shape index: {1}]  }
   0x1   :  { %21 = vsyncpa [#allocation6], 0 }
   0x2   :  { %22 = vsyncpa [#allocation4], 0  ;;  %s3134_s29 = smov [#allocation2]   ;;  %s3062_s17 = scalar_lea.hbm %s3660_s2, 16384 }
   0x3   :  { %s32_s30 = sshll.u32 %s3134_s29, 4  ;;  %p3063_p0 = scmp.ne.s32.totalorder %s3660_s2, %s3062_s17  ;;  %s33_s30 = int_to_ptr.vmem [resolvable:$true] %s32_s30 }
   0x4   :  { %p3066_p1 = scmp.lt.u32.totalorder %s3062_s17, %s3660_s2 }
   0x6   :  { %p3068_p2 = pnand %p3066_p1, %p3063_p0 }
   0x8   :  { %3071 = shalt.err (!%p3068_p2)
}
   0x9   :  { %s3072_s22 = scalar_lea.vmem %s33_s30, 16384  ;;  %p3077_p4 = scmp.lt.s32.totalorder %s33_s30, %s33_s30 }
   0xa   :  { %p3073_p3 = scmp.ne.s32.totalorder %s33_s30, %s3072_s22  ;;  %p3078_p5 = scmp.lt.s32.totalorder %s3072_s22, %s3072_s22 }
   0xc   :  { %p3079_p6 = por %p3078_p5, %p3077_p4 }
   0xe   :  { %p3080_p7 = pnand %p3079_p6, %p3073_p3 }
  0x10   :  { %3083 = shalt.err (!%p3080_p7)
}
  0x11   :  { %s3135_s23 = smov 128   ;;  %s3136_s24 = smov 8  }
  0x12   :  { %38 = dma.hbm_to_vmem [thread:$0]  %s3660_s2, 16384, %s33_s30, [#allocation3], %s3135_s23, %s3135_s23, %s3136_s24  }
  0x13   :  { %s3137_s27 = smov [#allocation5]   ;;  %s3084_s16 = scalar_lea.hbm %s3662_s4, 32 }
  0x14   :  { %s47_s28 = sshll.u32 %s3137_s27, 4  ;;  %p3085_p8 = scmp.ne.s32.totalorder %s3662_s4, %s3084_s16  ;;  %s48_s28 = int_to_ptr.vmem [resolvable:$true] %s47_s28 }
  0x15   :  { %p3088_p9 = scmp.lt.u32.totalorder %s3084_s16, %s3662_s4 }
  0x17   :  { %p3090_p10 = pnand %p3088_p9, %p3085_p8 }
  0x19   :  { %3093 = shalt.err (!%p3090_p10)
}
  0x1a   :  { %s3094_s21 = scalar_lea.vmem %s48_s28, 32  ;;  %p3099_p12 = scmp.lt.s32.totalorder %s48_s28, %s48_s28 }
  0x1b   :  { %p3095_p11 = scmp.ne.s32.totalorder %s48_s28, %s3094_s21  ;;  %p3100_p13 = scmp.lt.s32.totalorder %s3094_s21, %s3094_s21 }
  0x1d   :  { %p3101_p0 = por %p3100_p13, %p3099_p12 }
  0x1f   :  { %p3102_p1 = pnand %p3101_p0, %p3095_p11 }
  0x21   :  { %3105 = shalt.err (!%p3102_p1)
}
  0x22   :  { %50 = dma.hbm_to_vmem [thread:$0]  %s3662_s4, 32, %s48_s28, [#allocation6]  }
  0x23   :  { %3128 = dma.done.wait [#allocation3], 16384  }
  0x24   :  { %3129 = vsyncadd [#allocation3], 4294950912 }
  0x25   :  { %3130 = dma.done.wait [#allocation6], 32  }
  0x26   :  { %3131 = vsyncadd [#allocation6], 4294967264  ;;  %v2744_v0 = vld [vmem:[#allocation2 + $0x4] ss:$8 sps:$4 sm:$0xff]   ;;  %v2746_v1 = vld [vmem:[#allocation2] ss:$8 sps:$4 sm:$0xff]  }
  0x27   :  { %875 = vmatprep.subr.bf16.mxu0 %v2744_v0  ;;  %v2747_v2 = vld [vmem:[#allocation2 + $0x14] ss:$8 sps:$4 sm:$0xff]   ;;  %v2749_v3 = vld [vmem:[#allocation2 + $0x10] ss:$8 sps:$4 sm:$0xff]   ;;  %v2750_v4 = vld [vmem:[#allocation2 + $0x24] ss:$8 sps:$4 sm:$0xff]  }
  0x28   :  { %876 = vmatpush1.bf16.msra.mxu0 %v2746_v1  ;;  %v2752_v5 = vld [vmem:[#allocation2 + $0x20] ss:$8 sps:$4 sm:$0xff]   ;;  %v2753_v6 = vld [vmem:[#allocation2 + $0x34] ss:$8 sps:$4 sm:$0xff]   ;;  %v2755_v7 = vld [vmem:[#allocation2 + $0x30] ss:$8 sps:$4 sm:$0xff]  }
  0x29   :  { %877 = vmatprep.subr.bf16.mxu0 %v2747_v2  ;;  %v2756_v8 = vld [vmem:[#allocation2 + $0x44] ss:$8 sps:$4 sm:$0xff]   ;;  %v2758_v9 = vld [vmem:[#allocation2 + $0x40] ss:$8 sps:$4 sm:$0xff]   ;;  %v2759_v10 = vld [vmem:[#allocation2 + $0x54] ss:$8 sps:$4 sm:$0xff]  }
  0x2a   :  { %v2761_v11 = vld [vmem:[#allocation2 + $0x50] ss:$8 sps:$4 sm:$0xff]   ;;  %v2762_v12 = vld [vmem:[#allocation2 + $0x64] ss:$8 sps:$4 sm:$0xff]   ;;  %v2764_v15 = vld [vmem:[#allocation2 + $0x60] ss:$8 sps:$4 sm:$0xff]  }
  0x2b   :  { %v74_v13 = vld [vmem:[%s3658_s0] sm:$0x77]  ;;  %v2765_v16 = vld [vmem:[#allocation2 + $0x74] ss:$8 sps:$4 sm:$0xff]   ;;  %v2767_v17 = vld [vmem:[#allocation2 + $0x70] ss:$8 sps:$4 sm:$0xff]  }
  0x2c   :  { %878 = vmatpush1.bf16.msra.mxu0 %v2749_v3  ;;  %v2359_v14 = vcombine.high %v74_v13, %v74_v13  ;;  %v2768_v18 = vld [vmem:[#allocation2 + $0x84] ss:$8 sps:$4 sm:$0xff]   ;;  %v2770_v19 = vld [vmem:[#allocation2 + $0x80] ss:$8 sps:$4 sm:$0xff]   ;;  %v2771_v20 = vld [vmem:[#allocation2 + $0x94] ss:$8 sps:$4 sm:$0xff]   ;;  %v2358_v36 = vcombine.low %v74_v13, %v74_v13 }
  0x2d   :  { %879 = vmatprep.subr.bf16.mxu0 %v2750_v4  ;;  %v2773_v21 = vld [vmem:[#allocation2 + $0x90] ss:$8 sps:$4 sm:$0xff]   ;;  %v2774_v22 = vld [vmem:[#allocation2 + $0xa4] ss:$8 sps:$4 sm:$0xff]   ;;  %v2776_v23 = vld [vmem:[#allocation2 + $0xa0] ss:$8 sps:$4 sm:$0xff]  }
  0x2e   :  { %907 = vmatprep.mubr.bf16.mxu0 %v2359_v14  ;;  %v2777_v24 = vld [vmem:[#allocation2 + $0xb4] ss:$8 sps:$4 sm:$0xff]   ;;  %v2779_v25 = vld [vmem:[#allocation2 + $0xb0] ss:$8 sps:$4 sm:$0xff]   ;;  %v2780_v26 = vld [vmem:[#allocation2 + $0xc4] ss:$8 sps:$4 sm:$0xff]  }
  0x2f   :  { %v2782_v27 = vld [vmem:[#allocation2 + $0xc0] ss:$8 sps:$4 sm:$0xff]   ;;  %v2783_v28 = vld [vmem:[#allocation2 + $0xd4] ss:$8 sps:$4 sm:$0xff]   ;;  %v2785_v29 = vld [vmem:[#allocation2 + $0xd0] ss:$8 sps:$4 sm:$0xff]  }
  0x30   :  { %880 = vmatpush1.bf16.msra.mxu0 %v2752_v5  ;;  %v2786_v30 = vld [vmem:[#allocation2 + $0xe4] ss:$8 sps:$4 sm:$0xff]   ;;  %v2788_v31 = vld [vmem:[#allocation2 + $0xe0] ss:$8 sps:$4 sm:$0xff]   ;;  %v2789_v32 = vld [vmem:[#allocation2 + $0xf4] ss:$8 sps:$4 sm:$0xff]  }
  0x31   :  { %881 = vmatprep.subr.bf16.mxu0 %v2753_v6  ;;  %v2791_v33 = vld [vmem:[#allocation2 + $0xf0] ss:$8 sps:$4 sm:$0xff]   ;;  %v2796_v34 = vld [vmem:[#allocation2 + $0x104] ss:$8 sps:$4 sm:$0xff]   ;;  %v2794_v37 = vld [vmem:[#allocation2 + $0x100] ss:$8 sps:$4 sm:$0xff]  }
  0x32   :  { %v3246_v35 = vld [vmem:[%s3658_s0 + $0x8] sm:$0x77]  ;;  %v2799_v39 = vld [vmem:[#allocation2 + $0x114] ss:$8 sps:$4 sm:$0xff]   ;;  %v2797_v40 = vld [vmem:[#allocation2 + $0x110] ss:$8 sps:$4 sm:$0xff]  }
  0x33   :  { %v2361_v38 = vcombine.high %v3246_v35, %v3246_v35  ;;  %v2802_v41 = vld [vmem:[#allocation2 + $0x124] ss:$8 sps:$4 sm:$0xff]   ;;  %v2800_v42 = vld [vmem:[#allocation2 + $0x120] ss:$8 sps:$4 sm:$0xff]   ;;  %v2805_v43 = vld [vmem:[#allocation2 + $0x134] ss:$8 sps:$4 sm:$0xff]  }
  0x34   :  { %882 = vmatpush1.bf16.msra.mxu0 %v2755_v7  ;;  %v2803_v44 = vld [vmem:[#allocation2 + $0x130] ss:$8 sps:$4 sm:$0xff]   ;;  %v2808_v45 = vld [vmem:[#allocation2 + $0x144] ss:$8 sps:$4 sm:$0xff]   ;;  %v2806_v46 = vld [vmem:[#allocation2 + $0x140] ss:$8 sps:$4 sm:$0xff]  }
  0x35   :  { %883 = vmatprep.subr.bf16.mxu0 %v2756_v8  ;;  %v2811_v47 = vld [vmem:[#allocation2 + $0x154] ss:$8 sps:$4 sm:$0xff]   ;;  %v2809_v48 = vld [vmem:[#allocation2 + $0x150] ss:$8 sps:$4 sm:$0xff]   ;;  %v2814_v49 = vld [vmem:[#allocation2 + $0x164] ss:$8 sps:$4 sm:$0xff]   ;;  %v2360_v8 = vcombine.low %v3246_v35, %v3246_v35 }
  0x36   :  { %v2812_v50 = vld [vmem:[#allocation2 + $0x160] ss:$8 sps:$4 sm:$0xff]   ;;  %v2817_v51 = vld [vmem:[#allocation2 + $0x174] ss:$8 sps:$4 sm:$0xff]   ;;  %v2815_v52 = vld [vmem:[#allocation2 + $0x170] ss:$8 sps:$4 sm:$0xff]  }
  0x37   :  { %v2820_v53 = vld [vmem:[#allocation2 + $0x184] ss:$8 sps:$4 sm:$0xff]   ;;  %v2818_v54 = vld [vmem:[#allocation2 + $0x180] ss:$8 sps:$4 sm:$0xff]   ;;  %v2823_v55 = vld [vmem:[#allocation2 + $0x194] ss:$8 sps:$4 sm:$0xff]  }
  0x38   :  { %884 = vmatpush1.bf16.msra.mxu0 %v2758_v9  ;;  %v2821_v56 = vld [vmem:[#allocation2 + $0x190] ss:$8 sps:$4 sm:$0xff]   ;;  %v2826_v57 = vld [vmem:[#allocation2 + $0x1a4] ss:$8 sps:$4 sm:$0xff]   ;;  %v2824_v58 = vld [vmem:[#allocation2 + $0x1a0] ss:$8 sps:$4 sm:$0xff]  }
  0x39   :  { %885 = vmatprep.subr.bf16.mxu0 %v2759_v10  ;;  %v2829_v59 = vld [vmem:[#allocation2 + $0x1b4] ss:$8 sps:$4 sm:$0xff]   ;;  %v2827_v60 = vld [vmem:[#allocation2 + $0x1b0] ss:$8 sps:$4 sm:$0xff]   ;;  %v2832_v61 = vld [vmem:[#allocation2 + $0x1c4] ss:$8 sps:$4 sm:$0xff]  }
  0x3a   :  { %v2830_v62 = vld [vmem:[#allocation2 + $0x1c0] ss:$8 sps:$4 sm:$0xff]   ;;  %v2835_v63 = vld [vmem:[#allocation2 + $0x1d4] ss:$8 sps:$4 sm:$0xff]   ;;  %v2833_v0 = vld [vmem:[#allocation2 + $0x1d0] ss:$8 sps:$4 sm:$0xff]  }
  0x3b   :  { %v2838_v1 = vld [vmem:[#allocation2 + $0x1e4] ss:$8 sps:$4 sm:$0xff]   ;;  %v2836_v2 = vld [vmem:[#allocation2 + $0x1e0] ss:$8 sps:$4 sm:$0xff]   ;;  %v2841_v3 = vld [vmem:[#allocation2 + $0x1f4] ss:$8 sps:$4 sm:$0xff]  }
  0x3c   :  { %886 = vmatpush1.bf16.msra.mxu0 %v2761_v11  ;;  %v2839_v4 = vld [vmem:[#allocation2 + $0x1f0] ss:$8 sps:$4 sm:$0xff]   ;;  %v2846_v5 = vld [vmem:[#allocation2 + $0x204] ss:$8 sps:$4 sm:$0xff]   ;;  %v2844_v7 = vld [vmem:[#allocation2 + $0x200] ss:$8 sps:$4 sm:$0xff]  }
  0x3d   :  { %887 = vmatprep.subr.bf16.mxu0 %v2762_v12  ;;  %v3253_v6 = vld [vmem:[%s3658_s0 + $0x10] sm:$0x77]  ;;  %v2944_v11 = vld [vmem:[%s3661_s3 + $0x4] ss:$8 sps:$4 sm:$0xff]   ;;  %v2946_v12 = vld [vmem:[%s3661_s3] ss:$8 sps:$4 sm:$0xff]  }
  0x3e   :  { %v2849_v9 = vld [vmem:[#allocation2 + $0x214] ss:$8 sps:$4 sm:$0xff]   ;;  %v2363_v10 = vcombine.high %v3253_v6, %v3253_v6  ;;  %v2847_v14 = vld [vmem:[#allocation2 + $0x210] ss:$8 sps:$4 sm:$0xff]   ;;  %1309 = vmatprep.subr.bf16.mxu1 %v2944_v11  ;;  %v2870_v35 = vld [vmem:[#allocation2 + $0x284] ss:$8 sps:$4 sm:$0xff]  }
  0x3f   :  { %v2947_v13 = vld [vmem:[%s3661_s3 + $0x14] ss:$8 sps:$4 sm:$0xff]   ;;  %1310 = vmatpush1.bf16.msra.mxu1 %v2946_v12  ;;  %v2924_v11 = vld [vmem:[#allocation2 + $0x3a0] ss:$8 sps:$4 sm:$0xff]   ;;  %vm1041_vm0 = vcmask 1045504   ;;  %vm1354_vm1 = vcmask 48128  }
  0x40   :  { %888 = vmatpush1.bf16.msra.mxu0 %v2764_v15  ;;  %v2852_v15 = vld [vmem:[#allocation2 + $0x224] ss:$8 sps:$4 sm:$0xff]   ;;  %1311 = vmatprep.subr.bf16.mxu1 %v2947_v13  ;;  %v2929_v12 = vld [vmem:[#allocation2 + $0x3b4] ss:$8 sps:$4 sm:$0xff]   ;;  %v2927_v13 = vld [vmem:[#allocation2 + $0x3b0] ss:$8 sps:$4 sm:$0xff]  }
  0x41   :  { %889 = vmatprep.subr.bf16.mxu0 %v2765_v16  ;;  %v2850_v16 = vld [vmem:[#allocation2 + $0x220] ss:$8 sps:$4 sm:$0xff]   ;;  %vm3139_vm4 = vmmov 0   ;;  %vm2045_vm6 = vcmask 1041409   ;;  %vm2042_vm7 = vcmask 1040384   ;;  %vm2035_vm8 = vcmask 13312  }
  0x42   :  { %vm2336_vm9 = vcmask 17408  }
  0x44   :  { %890 = vmatpush1.bf16.msra.mxu0 %v2767_v17  ;;  %v2949_v17 = vld [vmem:[%s3661_s3 + $0x10] ss:$8 sps:$4 sm:$0xff]  }
  0x45   :  { %891 = vmatprep.subr.bf16.mxu0 %v2768_v18  ;;  %v2950_v18 = vld [vmem:[%s3661_s3 + $0x24] ss:$8 sps:$4 sm:$0xff]   ;;  %1312 = vmatpush1.bf16.msra.mxu1 %v2949_v17  ;;  %v2933_v17 = vld [vmem:[#allocation2 + $0x3d0] ss:$8 sps:$4 sm:$0xff]  }
  0x46   :  { %1313 = vmatprep.subr.bf16.mxu1 %v2950_v18  ;;  %v2938_v18 = vld [vmem:[#allocation2 + $0x3e4] ss:$8 sps:$4 sm:$0xff]  }
  0x48   :  { %892 = vmatpush1.bf16.msra.mxu0 %v2770_v19  ;;  %v2855_v19 = vld [vmem:[#allocation2 + $0x234] ss:$8 sps:$4 sm:$0xff]  }
  0x49   :  { %893 = vmatprep.subr.bf16.mxu0 %v2771_v20  ;;  %v2952_v20 = vld [vmem:[%s3661_s3 + $0x20] ss:$8 sps:$4 sm:$0xff]  }
  0x4a   :  { %1314 = vmatpush1.bf16.msra.mxu1 %v2952_v20  ;;  %v2941_v20 = vld [vmem:[#allocation2 + $0x3f4] ss:$8 sps:$4 sm:$0xff]  }
  0x4c   :  { %894 = vmatpush1.bf16.msra.mxu0 %v2773_v21  ;;  %v2953_v21 = vld [vmem:[%s3661_s3 + $0x34] ss:$8 sps:$4 sm:$0xff]  }
  0x4d   :  { %895 = vmatprep.subr.bf16.mxu0 %v2774_v22  ;;  %v2853_v22 = vld [vmem:[#allocation2 + $0x230] ss:$8 sps:$4 sm:$0xff]   ;;  %1315 = vmatprep.subr.bf16.mxu1 %v2953_v21 }
  0x4e   :  { %v2939_v21 = vld [vmem:[#allocation2 + $0x3f0] ss:$8 sps:$4 sm:$0xff]  }
  0x50   :  { %896 = vmatpush1.bf16.msra.mxu0 %v2776_v23  ;;  %v2858_v23 = vld [vmem:[#allocation2 + $0x244] ss:$8 sps:$4 sm:$0xff]  }
  0x51   :  { %897 = vmatprep.subr.bf16.mxu0 %v2777_v24  ;;  %v2955_v24 = vld [vmem:[%s3661_s3 + $0x30] ss:$8 sps:$4 sm:$0xff]  }
  0x52   :  { %1316 = vmatpush1.bf16.msra.mxu1 %v2955_v24  ;;  %v2962_v24 = vld [vmem:[%s3661_s3 + $0x64] ss:$8 sps:$4 sm:$0xff]  }
  0x54   :  { %898 = vmatpush1.bf16.msra.mxu0 %v2779_v25  ;;  %v2956_v25 = vld [vmem:[%s3661_s3 + $0x44] ss:$8 sps:$4 sm:$0xff]  }
  0x55   :  { %899 = vmatprep.subr.bf16.mxu0 %v2780_v26  ;;  %v2856_v26 = vld [vmem:[#allocation2 + $0x240] ss:$8 sps:$4 sm:$0xff]   ;;  %1317 = vmatprep.subr.bf16.mxu1 %v2956_v25 }
  0x56   :  { %v2964_v25 = vld [vmem:[%s3661_s3 + $0x60] ss:$8 sps:$4 sm:$0xff]  }
  0x58   :  { %900 = vmatpush1.bf16.msra.mxu0 %v2782_v27  ;;  %v2861_v27 = vld [vmem:[#allocation2 + $0x254] ss:$8 sps:$4 sm:$0xff]  }
  0x59   :  { %901 = vmatprep.subr.bf16.mxu0 %v2783_v28  ;;  %v2958_v28 = vld [vmem:[%s3661_s3 + $0x40] ss:$8 sps:$4 sm:$0xff]  }
  0x5a   :  { %1318 = vmatpush1.bf16.msra.mxu1 %v2958_v28  ;;  %v2968_v28 = vld [vmem:[%s3661_s3 + $0x84] ss:$8 sps:$4 sm:$0xff]  }
  0x5c   :  { %902 = vmatpush1.bf16.msra.mxu0 %v2785_v29  ;;  %v2959_v29 = vld [vmem:[%s3661_s3 + $0x54] ss:$8 sps:$4 sm:$0xff]  }
  0x5d   :  { %903 = vmatprep.subr.bf16.mxu0 %v2786_v30  ;;  %v2859_v30 = vld [vmem:[#allocation2 + $0x250] ss:$8 sps:$4 sm:$0xff]   ;;  %1319 = vmatprep.subr.bf16.mxu1 %v2959_v29  ;;  %v2970_v29 = vld [vmem:[%s3661_s3 + $0x80] ss:$8 sps:$4 sm:$0xff]  }
  0x60   :  { %904 = vmatpush1.bf16.msra.mxu0 %v2788_v31  ;;  %v2864_v31 = vld [vmem:[#allocation2 + $0x264] ss:$8 sps:$4 sm:$0xff]  }
  0x61   :  { %905 = vmatprep.subr.bf16.mxu0 %v2789_v32  ;;  %v2862_v32 = vld [vmem:[#allocation2 + $0x260] ss:$8 sps:$4 sm:$0xff]  }
  0x64   :  { %906 = vmatpush1.bf16.msra.mxu0 %v2791_v33  ;;  %v2867_v33 = vld [vmem:[#allocation2 + $0x274] ss:$8 sps:$4 sm:$0xff]  }
  0x65   :  { %916 = vmatprep.subr.bf16.mxu0 %v2796_v34  ;;  %v2865_v34 = vld [vmem:[#allocation2 + $0x270] ss:$8 sps:$4 sm:$0xff]  }
  0x67   :  { %908 = vmatmul.mubr.bf16.vlgmr.msra.gmra.mrb[0].mxu0 %v2358_v36  ;;  %v2868_v36 = vld [vmem:[#allocation2 + $0x280] ss:$8 sps:$4 sm:$0xff]  }
  0x68   :  { %917 = vmatpush1.bf16.msra.mxu0 %v2794_v37  ;;  %948 = vmatprep.mubr.bf16.mxu0 %v2361_v38  ;;  %v2873_v37 = vld [vmem:[#allocation2 + $0x294] ss:$8 sps:$4 sm:$0xff]   ;;  %v2871_v38 = vld [vmem:[#allocation2 + $0x290] ss:$8 sps:$4 sm:$0xff]  }
  0x69   :  { %918 = vmatprep.subr.bf16.mxu0 %v2799_v39  ;;  %v2876_v39 = vld [vmem:[#allocation2 + $0x2a4] ss:$8 sps:$4 sm:$0xff]  }
  0x6c   :  { %919 = vmatpush1.bf16.msra.mxu0 %v2797_v40  ;;  %v2874_v40 = vld [vmem:[#allocation2 + $0x2a0] ss:$8 sps:$4 sm:$0xff]  }
  0x6d   :  { %920 = vmatprep.subr.bf16.mxu0 %v2802_v41  ;;  %v2879_v41 = vld [vmem:[#allocation2 + $0x2b4] ss:$8 sps:$4 sm:$0xff]  }
  0x70   :  { %921 = vmatpush1.bf16.msra.mxu0 %v2800_v42  ;;  %v2877_v42 = vld [vmem:[#allocation2 + $0x2b0] ss:$8 sps:$4 sm:$0xff]  }
  0x71   :  { %922 = vmatprep.subr.bf16.mxu0 %v2805_v43  ;;  %v2882_v43 = vld [vmem:[#allocation2 + $0x2c4] ss:$8 sps:$4 sm:$0xff]  }
  0x74   :  { %923 = vmatpush1.bf16.msra.mxu0 %v2803_v44  ;;  %v2880_v44 = vld [vmem:[#allocation2 + $0x2c0] ss:$8 sps:$4 sm:$0xff]  }
  0x75   :  { %924 = vmatprep.subr.bf16.mxu0 %v2808_v45  ;;  %v2885_v45 = vld [vmem:[#allocation2 + $0x2d4] ss:$8 sps:$4 sm:$0xff]  }
  0x78   :  { %925 = vmatpush1.bf16.msra.mxu0 %v2806_v46  ;;  %v2883_v46 = vld [vmem:[#allocation2 + $0x2d0] ss:$8 sps:$4 sm:$0xff]  }
  0x79   :  { %926 = vmatprep.subr.bf16.mxu0 %v2811_v47  ;;  %v2888_v47 = vld [vmem:[#allocation2 + $0x2e4] ss:$8 sps:$4 sm:$0xff]  }
  0x7c   :  { %927 = vmatpush1.bf16.msra.mxu0 %v2809_v48  ;;  %v2886_v48 = vld [vmem:[#allocation2 + $0x2e0] ss:$8 sps:$4 sm:$0xff]  }
  0x7d   :  { %928 = vmatprep.subr.bf16.mxu0 %v2814_v49  ;;  %v2891_v49 = vld [vmem:[#allocation2 + $0x2f4] ss:$8 sps:$4 sm:$0xff]  }
  0x80   :  { %929 = vmatpush1.bf16.msra.mxu0 %v2812_v50  ;;  %v2889_v50 = vld [vmem:[#allocation2 + $0x2f0] ss:$8 sps:$4 sm:$0xff]  }
  0x81   :  { %930 = vmatprep.subr.bf16.mxu0 %v2817_v51  ;;  %v2896_v51 = vld [vmem:[#allocation2 + $0x304] ss:$8 sps:$4 sm:$0xff]  }
  0x84   :  { %931 = vmatpush1.bf16.msra.mxu0 %v2815_v52  ;;  %v3295_v52 = vld [vmem:[%s3658_s0 + $0x18] sm:$0x77]  ;;  %s3140_s0 = smov [#allocation7]  }
  0x85   :  { %932 = vmatprep.subr.bf16.mxu0 %v2820_v53  ;;  %v2362_v53 = vcombine.low %v3253_v6, %v3253_v6  ;;  %v2920_v6 = vld [vmem:[#allocation2 + $0x384] ss:$8 sps:$4 sm:$0xff]   ;;  %s2346_s18 = sshll.u32 %s3140_s0, 4  ;;  %s2347_s18 = int_to_ptr.vmem [resolvable:$true] %s2346_s18 }
  0x86   :  { %s3106_s19 = scalar_lea.vmem %s2347_s18, 32  ;;  %p3111_p3 = scmp.lt.s32.totalorder %s2347_s18, %s2347_s18 }
  0x87   :  { %p3107_p2 = scmp.ne.s32.totalorder %s2347_s18, %s3106_s19  ;;  %p3112_p4 = scmp.lt.s32.totalorder %s3106_s19, %s3106_s19 }
  0x88   :  { %933 = vmatpush1.bf16.msra.mxu0 %v2818_v54  ;;  %v2894_v54 = vld [vmem:[#allocation2 + $0x300] ss:$8 sps:$4 sm:$0xff]  }
  0x89   :  { %934 = vmatprep.subr.bf16.mxu0 %v2823_v55  ;;  %v2365_v55 = vcombine.high %v3295_v52, %v3295_v52  ;;  %p3113_p5 = por %p3112_p4, %p3111_p3 }
  0x8b   :  { %p3114_p6 = pnand %p3113_p5, %p3107_p2 }
  0x8c   :  { %935 = vmatpush1.bf16.msra.mxu0 %v2821_v56  ;;  %v2899_v56 = vld [vmem:[#allocation2 + $0x314] ss:$8 sps:$4 sm:$0xff]  }
  0x8d   :  { %936 = vmatprep.subr.bf16.mxu0 %v2826_v57  ;;  %v2897_v57 = vld [vmem:[#allocation2 + $0x310] ss:$8 sps:$4 sm:$0xff]  }
  0x90   :  { %937 = vmatpush1.bf16.msra.mxu0 %v2824_v58  ;;  %v2902_v58 = vld [vmem:[#allocation2 + $0x324] ss:$8 sps:$4 sm:$0xff]  }
  0x91   :  { %938 = vmatprep.subr.bf16.mxu0 %v2829_v59  ;;  %v2900_v59 = vld [vmem:[#allocation2 + $0x320] ss:$8 sps:$4 sm:$0xff]  }
  0x94   :  { %939 = vmatpush1.bf16.msra.mxu0 %v2827_v60  ;;  %v2905_v60 = vld [vmem:[#allocation2 + $0x334] ss:$8 sps:$4 sm:$0xff]  }
  0x95   :  { %940 = vmatprep.subr.bf16.mxu0 %v2832_v61  ;;  %v2903_v61 = vld [vmem:[#allocation2 + $0x330] ss:$8 sps:$4 sm:$0xff]  }
  0x98   :  { %941 = vmatpush1.bf16.msra.mxu0 %v2830_v62  ;;  %v2908_v62 = vld [vmem:[#allocation2 + $0x344] ss:$8 sps:$4 sm:$0xff]  }
  0x99   :  { %942 = vmatprep.subr.bf16.mxu0 %v2835_v63  ;;  %v2906_v63 = vld [vmem:[#allocation2 + $0x340] ss:$8 sps:$4 sm:$0xff]  }
  0x9c   :  { %943 = vmatpush1.bf16.msra.mxu0 %v2833_v0  ;;  %v2911_v0 = vld [vmem:[#allocation2 + $0x354] ss:$8 sps:$4 sm:$0xff]  }
  0x9d   :  { %944 = vmatprep.subr.bf16.mxu0 %v2838_v1  ;;  %v2909_v1 = vld [vmem:[#allocation2 + $0x350] ss:$8 sps:$4 sm:$0xff]  }
  0xa0   :  { %945 = vmatpush1.bf16.msra.mxu0 %v2836_v2  ;;  %v2914_v2 = vld [vmem:[#allocation2 + $0x364] ss:$8 sps:$4 sm:$0xff]  }
  0xa1   :  { %946 = vmatprep.subr.bf16.mxu0 %v2841_v3  ;;  %v2912_v3 = vld [vmem:[#allocation2 + $0x360] ss:$8 sps:$4 sm:$0xff]  }
  0xa4   :  { %947 = vmatpush1.bf16.msra.mxu0 %v2839_v4  ;;  %v2917_v4 = vld [vmem:[#allocation2 + $0x374] ss:$8 sps:$4 sm:$0xff]  }
  0xa5   :  { %957 = vmatprep.subr.bf16.mxu0 %v2846_v5  ;;  %v2915_v5 = vld [vmem:[#allocation2 + $0x370] ss:$8 sps:$4 sm:$0xff]  }
  0xa7   :  { %949 = vmatmul.mubr.bf16.vlgmr.msra.gmra.mrb[0].mxu0 %v2360_v8  ;;  %v2923_v8 = vld [vmem:[#allocation2 + $0x394] ss:$8 sps:$4 sm:$0xff]  }
  0xa8   :  { %958 = vmatpush1.bf16.msra.mxu0 %v2844_v7  ;;  %989 = vmatprep.mubr.bf16.mxu0 %v2363_v10  ;;  %v2918_v7 = vld [vmem:[#allocation2 + $0x380] ss:$8 sps:$4 sm:$0xff]   ;;  %v2926_v10 = vld [vmem:[#allocation2 + $0x3a4] ss:$8 sps:$4 sm:$0xff]  }
  0xa9   :  { %959 = vmatprep.subr.bf16.mxu0 %v2849_v9  ;;  %v2921_v9 = vld [vmem:[#allocation2 + $0x390] ss:$8 sps:$4 sm:$0xff]  }
  0xac   :  { %960 = vmatpush1.bf16.msra.mxu0 %v2847_v14  ;;  %v2932_v14 = vld [vmem:[#allocation2 + $0x3c4] ss:$8 sps:$4 sm:$0xff]  }
  0xad   :  { %961 = vmatprep.subr.bf16.mxu0 %v2852_v15  ;;  %v2930_v15 = vld [vmem:[#allocation2 + $0x3c0] ss:$8 sps:$4 sm:$0xff]  }
  0xb0   :  { %962 = vmatpush1.bf16.msra.mxu0 %v2850_v16  ;;  %v2935_v16 = vld [vmem:[#allocation2 + $0x3d4] ss:$8 sps:$4 sm:$0xff]  }
  0xb1   :  { %963 = vmatprep.subr.bf16.mxu0 %v2855_v19  ;;  %v2936_v19 = vld [vmem:[#allocation2 + $0x3e0] ss:$8 sps:$4 sm:$0xff]  }
  0xb4   :  { %964 = vmatpush1.bf16.msra.mxu0 %v2853_v22  ;;  %v2364_v22 = vcombine.low %v3295_v52, %v3295_v52 }
  0xb5   :  { %965 = vmatprep.subr.bf16.mxu0 %v2858_v23  ;;  %v2961_v23 = vld [vmem:[%s3661_s3 + $0x50] ss:$8 sps:$4 sm:$0xff]  }
  0xb6   :  { %1320 = vmatpush1.bf16.msra.mxu1 %v2961_v23 }
  0xb7   :  { %1321 = vmatprep.subr.bf16.mxu1 %v2962_v24 }
  0xb8   :  { %966 = vmatpush1.bf16.msra.mxu0 %v2856_v26  ;;  %v2965_v26 = vld [vmem:[%s3661_s3 + $0x74] ss:$8 sps:$4 sm:$0xff]  }
  0xb9   :  { %967 = vmatprep.subr.bf16.mxu0 %v2861_v27  ;;  %v2967_v27 = vld [vmem:[%s3661_s3 + $0x70] ss:$8 sps:$4 sm:$0xff]  }
  0xba   :  { %1322 = vmatpush1.bf16.msra.mxu1 %v2964_v25 }
  0xbb   :  { %1323 = vmatprep.subr.bf16.mxu1 %v2965_v26 }
  0xbc   :  { %968 = vmatpush1.bf16.msra.mxu0 %v2859_v30  ;;  %v2971_v30 = vld [vmem:[%s3661_s3 + $0x94] ss:$8 sps:$4 sm:$0xff]  }
  0xbd   :  { %969 = vmatprep.subr.bf16.mxu0 %v2864_v31  ;;  %v2973_v31 = vld [vmem:[%s3661_s3 + $0x90] ss:$8 sps:$4 sm:$0xff]  }
  0xbe   :  { %1324 = vmatpush1.bf16.msra.mxu1 %v2967_v27  ;;  %v1039_v27 = vld [vmem:[#allocation5] sm:$0x3] }
  0xbf   :  { %1325 = vmatprep.subr.bf16.mxu1 %v2968_v28 }
  0xc0   :  { %970 = vmatpush1.bf16.msra.mxu0 %v2862_v32  ;;  %v2974_v32 = vld [vmem:[%s3661_s3 + $0xa4] ss:$8 sps:$4 sm:$0xff]  }
  0xc1   :  { %971 = vmatprep.subr.bf16.mxu0 %v2867_v33  ;;  %v2976_v33 = vld [vmem:[%s3661_s3 + $0xa0] ss:$8 sps:$4 sm:$0xff]  }
  0xc2   :  { %1326 = vmatpush1.bf16.msra.mxu1 %v2970_v29  ;;  %v1040_v29 = vld [vmem:[%s3663_s5] sm:$0x3] }
  0xc3   :  { %1327 = vmatprep.subr.bf16.mxu1 %v2971_v30 }
  0xc4   :  { %972 = vmatpush1.bf16.msra.mxu0 %v2865_v34  ;;  %v2977_v34 = vld [vmem:[%s3661_s3 + $0xb4] ss:$8 sps:$4 sm:$0xff]  }
  0xc5   :  { %973 = vmatprep.subr.bf16.mxu0 %v2870_v35  ;;  %v2979_v35 = vld [vmem:[%s3661_s3 + $0xb0] ss:$8 sps:$4 sm:$0xff]  }
  0xc6   :  { %1328 = vmatpush1.bf16.msra.mxu1 %v2973_v31 }
  0xc7   :  { %1329 = vmatprep.subr.bf16.mxu1 %v2974_v32 }
  0xc8   :  { %974 = vmatpush1.bf16.msra.mxu0 %v2868_v36  ;;  %v2980_v36 = vld [vmem:[%s3661_s3 + $0xc4] ss:$8 sps:$4 sm:$0xff]  }
  0xc9   :  { %975 = vmatprep.subr.bf16.mxu0 %v2873_v37  ;;  %v2982_v37 = vld [vmem:[%s3661_s3 + $0xc0] ss:$8 sps:$4 sm:$0xff]  }
  0xca   :  { %1330 = vmatpush1.bf16.msra.mxu1 %v2976_v33 }
  0xcb   :  { %1331 = vmatprep.subr.bf16.mxu1 %v2977_v34 }
  0xcc   :  { %976 = vmatpush1.bf16.msra.mxu0 %v2871_v38  ;;  %v2983_v38 = vld [vmem:[%s3661_s3 + $0xd4] ss:$8 sps:$4 sm:$0xff]  }
  0xcd   :  { %977 = vmatprep.subr.bf16.mxu0 %v2876_v39  ;;  %v2985_v39 = vld [vmem:[%s3661_s3 + $0xd0] ss:$8 sps:$4 sm:$0xff]  }
  0xce   :  { %1332 = vmatpush1.bf16.msra.mxu1 %v2979_v35 }
  0xcf   :  { %1333 = vmatprep.subr.bf16.mxu1 %v2980_v36 }
  0xd0   :  { %978 = vmatpush1.bf16.msra.mxu0 %v2874_v40  ;;  %v2986_v40 = vld [vmem:[%s3661_s3 + $0xe4] ss:$8 sps:$4 sm:$0xff]  }
  0xd1   :  { %979 = vmatprep.subr.bf16.mxu0 %v2879_v41  ;;  %v2988_v41 = vld [vmem:[%s3661_s3 + $0xe0] ss:$8 sps:$4 sm:$0xff]  }
  0xd2   :  { %1334 = vmatpush1.bf16.msra.mxu1 %v2982_v37 }
  0xd3   :  { %1335 = vmatprep.subr.bf16.mxu1 %v2983_v38 }
  0xd4   :  { %980 = vmatpush1.bf16.msra.mxu0 %v2877_v42  ;;  %v2989_v42 = vld [vmem:[%s3661_s3 + $0xf4] ss:$8 sps:$4 sm:$0xff]  }
  0xd5   :  { %981 = vmatprep.subr.bf16.mxu0 %v2882_v43  ;;  %v2991_v43 = vld [vmem:[%s3661_s3 + $0xf0] ss:$8 sps:$4 sm:$0xff]  }
  0xd6   :  { %1336 = vmatpush1.bf16.msra.mxu1 %v2985_v39 }
  0xd7   :  { %1337 = vmatprep.subr.bf16.mxu1 %v2986_v40 }
  0xd8   :  { %982 = vmatpush1.bf16.msra.mxu0 %v2880_v44 }
  0xd9   :  { %983 = vmatprep.subr.bf16.mxu0 %v2885_v45 }
  0xda   :  { %1338 = vmatpush1.bf16.msra.mxu1 %v2988_v41 }
  0xdb   :  { %1339 = vmatprep.subr.bf16.mxu1 %v2989_v42 }
  0xdc   :  { %984 = vmatpush1.bf16.msra.mxu0 %v2883_v46 }
  0xdd   :  { %985 = vmatprep.subr.bf16.mxu0 %v2888_v47 }
  0xde   :  { %1340 = vmatpush1.bf16.msra.mxu1 %v2991_v43 }
  0xe0   :  { %986 = vmatpush1.bf16.msra.mxu0 %v2886_v48 }
  0xe1   :  { %987 = vmatprep.subr.bf16.mxu0 %v2891_v49 }
  0xe4   :  { %988 = vmatpush1.bf16.msra.mxu0 %v2889_v50 }
  0xe5   :  { %998 = vmatprep.subr.bf16.mxu0 %v2896_v51 }
  0xe7   :  { %990 = vmatmul.mubr.bf16.vlgmr.msra.gmra.mrb[0].mxu0 %v2362_v53 }
  0xe8   :  { %999 = vmatpush1.bf16.msra.mxu0 %v2894_v54  ;;  %1030 = vmatprep.mubr.bf16.mxu0 %v2365_v55 }
  0xe9   :  { %1000 = vmatprep.subr.bf16.mxu0 %v2899_v56 }
  0xec   :  { %1001 = vmatpush1.bf16.msra.mxu0 %v2897_v57 }
  0xed   :  { %1002 = vmatprep.subr.bf16.mxu0 %v2902_v58 }
  0xf0   :  { %1003 = vmatpush1.bf16.msra.mxu0 %v2900_v59 }
  0xf1   :  { %1004 = vmatprep.subr.bf16.mxu0 %v2905_v60 }
  0xf4   :  { %1005 = vmatpush1.bf16.msra.mxu0 %v2903_v61 }
  0xf5   :  { %1006 = vmatprep.subr.bf16.mxu0 %v2908_v62 }
  0xf8   :  { %1007 = vmatpush1.bf16.msra.mxu0 %v2906_v63 }
  0xf9   :  { %1008 = vmatprep.subr.bf16.mxu0 %v2911_v0 }
  0xfc   :  { %1009 = vmatpush1.bf16.msra.mxu0 %v2909_v1 }
  0xfd   :  { %1010 = vmatprep.subr.bf16.mxu0 %v2914_v2 }
 0x100   :  { %1011 = vmatpush1.bf16.msra.mxu0 %v2912_v3 }
 0x101   :  { %1012 = vmatprep.subr.bf16.mxu0 %v2917_v4 }
 0x104   :  { %1013 = vmatpush1.bf16.msra.mxu0 %v2915_v5 }
 0x105   :  { %1014 = vmatprep.subr.bf16.mxu0 %v2920_v6 }
 0x108   :  { %1015 = vmatpush1.bf16.msra.mxu0 %v2918_v7 }
 0x109   :  { %1016 = vmatprep.subr.bf16.mxu0 %v2923_v8 }
 0x10c   :  { %1017 = vmatpush1.bf16.msra.mxu0 %v2921_v9 }
 0x10d   :  { %1018 = vmatprep.subr.bf16.mxu0 %v2926_v10 }
 0x110   :  { %1019 = vmatpush1.bf16.msra.mxu0 %v2924_v11 }
 0x111   :  { %1020 = vmatprep.subr.bf16.mxu0 %v2929_v12 }
 0x114   :  { %1021 = vmatpush1.bf16.msra.mxu0 %v2927_v13 }
 0x115   :  { %1022 = vmatprep.subr.bf16.mxu0 %v2932_v14 }
 0x118   :  { %1023 = vmatpush1.bf16.msra.mxu0 %v2930_v15 }
 0x119   :  { %1024 = vmatprep.subr.bf16.mxu0 %v2935_v16 }
 0x11c   :  { %1025 = vmatpush1.bf16.msra.mxu0 %v2933_v17 }
 0x11d   :  { %1026 = vmatprep.subr.bf16.mxu0 %v2938_v18 }
 0x120   :  { %1027 = vmatpush1.bf16.msra.mxu0 %v2936_v19 }
 0x121   :  { %1028 = vmatprep.subr.bf16.mxu0 %v2941_v20 }
 0x124   :  { %1029 = vmatpush1.bf16.msra.mxu0 %v2939_v21  ;;  %v1090_v21 = vlaneseq }
 0x126   :  { %v1091_v25 = vshrl.u32 %v1090_v21, 7 }
 0x127   :  { %1031 = vmatmul.mubr.bf16.vlgmr.msra.gmra.mrb[0].mxu0 %v2364_v22 }
 0x128   :  { %v1092_v26 = vsub.s32 0, %v1091_v25  ;;  %v1096_v28 = vsub.s32 1, %v1091_v25 }
 0x12a   :  { %v1093_v31 = vrot.slane %v1039_v27, %v1092_v26  ;;  %v1097_v34 = vrot.slane %v1039_v27, %v1096_v28  ;;  %v1106_v37 = vrot.slane %v1040_v29, %v1092_v26  ;;  %v1110_v39 = vrot.slane %v1040_v29, %v1096_v28  ;;  %v3008_v28 = vld [vmem:[%s3665_s7] sm:$0xff]   ;;  %v3009_v29 = vld [vmem:[%s3665_s7 + $0x8] sm:$0xff]  }
 0x1fa   :  { %v1032_v44 = vpop.f32.mrb[0].mxu0 }
 0x1fb   :  { %v1042_v45 = vsel %vm1041_vm0, %v1032_v44, 0.0  ;;  %v1059_v46 = vmul.f32 %v1032_v44, %v1032_v44  ;;  %v1034_v47 = vpop.f32.mrb[1].mxu0 }
 0x1fc   :  { %v1043_v48 = vrot.slane %v1042_v45, 4  ;;  %v1049_v49 = vsel %vm1041_vm0, %v1034_v47, 0.0  ;;  %v1060_v50 = vmul.f32 %v1034_v47, %v1034_v47  ;;  %v1036_v51 = vpop.f32.mrb[2].mxu0 }
 0x1fd   :  { %v1061_v52 = vsel %vm1041_vm0, %v1059_v46, 0.0  ;;  %v1050_v53 = vrot.slane %v1049_v49, 4  ;;  %v1037_v54 = vpop.f32.mrb[3].mxu0  ;;  %v3138_v46 = vmov 0.0  }
 0x1fe   :  { %v1044_v55 = vadd.f32 %v1043_v48, %v1042_v45  ;;  %v1062_v56 = vrot.slane %v1061_v52, 4  ;;  %v1068_v57 = vsel %vm1041_vm0, %v1060_v50, 0.0 }
 0x1ff   :  { %v1051_v58 = vadd.f32 %v1050_v53, %v1049_v49  ;;  %v1069_v59 = vrot.slane %v1068_v57, 4  ;;  %v3393_v53 = vld [vmem:[%s3659_s1] sm:$0x3f] }
 0x200   :  { %v1045_v60 = vrot.slane %v1044_v55, 2  ;;  %v1063_v61 = vadd.f32 %v1062_v56, %v1061_v52 }
 0x201   :  { %v1052_v62 = vrot.slane %v1051_v58, 2  ;;  %v1070_v63 = vadd.f32 %v1069_v59, %v1068_v57  ;;  %v2993_v57 = vld [vmem:[%s3664_s6] sm:$0xff]   ;;  %v2995_v59 = vld [vmem:[%s3664_s6 + $0x8] sm:$0xff]  }
 0x202   :  { %v1046_v0 = vadd.f32 %v1045_v60, %v1044_v55  ;;  %v1064_v1 = vrot.slane %v1063_v61, 2  ;;  %v2992_v55 = vld [vmem:[%s3664_s6 + $0x40] sm:$0xff]   ;;  %v2996_v60 = vld [vmem:[%s3664_s6 + $0x50] sm:$0xff]  }
 0x203   :  { %v1053_v2 = vadd.f32 %v1052_v62, %v1051_v58  ;;  %v1071_v3 = vrot.slane %v1070_v63, 2  ;;  %v2994_v58 = vld [vmem:[%s3664_s6 + $0x48] sm:$0xff]   ;;  %v2998_v62 = vld [vmem:[%s3664_s6 + $0x58] sm:$0xff]  }
 0x204   :  { %v1047_v4 = vrot.slane %v1046_v0, 1  ;;  %v1065_v5 = vadd.f32 %v1064_v1, %v1063_v61  ;;  %v2997_v61 = vld [vmem:[%s3664_s6 + $0x10] sm:$0xff]   ;;  %v3001_v1 = vld [vmem:[%s3664_s6 + $0x20] sm:$0xff]  }
 0x205   :  { %v1054_v6 = vrot.slane %v1053_v2, 1  ;;  %v1072_v7 = vadd.f32 %v1071_v3, %v1070_v63  ;;  %v2999_v63 = vld [vmem:[%s3664_s6 + $0x18] sm:$0xff]   ;;  %v3003_v3 = vld [vmem:[%s3664_s6 + $0x28] sm:$0xff]  }
 0x206   :  { %v1048_v8 = vadd.f32 %v1047_v4, %v1046_v0  ;;  %v1066_v9 = vrot.slane %v1065_v5, 1  ;;  %v3000_v0 = vld [vmem:[%s3664_s6 + $0x60] sm:$0xff]   ;;  %v3004_v4 = vld [vmem:[%s3664_s6 + $0x70] sm:$0xff]  }
 0x207   :  { %v1055_v10 = vadd.f32 %v1054_v6, %v1053_v2  ;;  %v1073_v11 = vrot.slane %v1072_v7, 1  ;;  %v3002_v2 = vld [vmem:[%s3664_s6 + $0x68] sm:$0xff]   ;;  %v3006_v6 = vld [vmem:[%s3664_s6 + $0x78] sm:$0xff]  }
 0x208   :  { %v1057_v12 = vmul.f32 0.16666667, %v1048_v8  ;;  %v1067_v13 = vadd.f32 %v1066_v9, %v1065_v5  ;;  %v3005_v5 = vld [vmem:[%s3664_s6 + $0x30] sm:$0xff]  }
 0x209   :  { %v1058_v14 = vmul.f32 0.16666667, %v1055_v10  ;;  %v1074_v15 = vadd.f32 %v1073_v11, %v1072_v7  ;;  %v3007_v7 = vld [vmem:[%s3664_s6 + $0x38] sm:$0xff]  }
 0x20a   :  { %v1075_v16 = vmul.f32 0.16666667, %v1067_v13  ;;  %v1077_v17 = vmul.f32 %v1057_v12, %v1057_v12  ;;  %v1081_v30 = vsub.f32 %v1032_v44, %v1057_v12 }
 0x20b   :  { %v1076_v18 = vmul.f32 0.16666667, %v1074_v15  ;;  %v1078_v19 = vmul.f32 %v1058_v14, %v1058_v14  ;;  %v1082_v33 = vsub.f32 %v1034_v47, %v1058_v14 }
 0x20c   :  { %v1079_v20 = vsub.f32 %v1075_v16, %v1077_v17 }
 0x20d   :  { %v1080_v22 = vsub.f32 %v1076_v18, %v1078_v19 }
 0x20e   :  { %v1083_v23 = vadd.f32 1e-05, %v1079_v20 }
 0x20f   :  { %v1084_v24 = vadd.f32 1e-05, %v1080_v22 }
 0x210   :  { %3048 = vrsqrt.f32 %v1083_v23 }
 0x211   :  { %3050 = vrsqrt.f32 %v1084_v24 }
 0x21a   :  { %v3049_v32 = vpop.eup %3048 }
 0x21b   :  { %v3051_v35 = vpop.eup %3050  ;;  %v1087_v36 = vmul.f32 %v3049_v32, %v1081_v30  ;;  %v3010_v30 = vld [vmem:[%s3665_s7 + $0x10] sm:$0xff]   ;;  %v3012_v32 = vld [vmem:[%s3665_s7 + $0x20] sm:$0xff]  }
 0x21c   :  { %v1088_v38 = vmul.f32 %v3051_v35, %v1082_v33  ;;  %v3013_v33 = vld [vmem:[%s3665_s7 + $0x28] sm:$0xff]   ;;  %v3015_v35 = vld [vmem:[%s3665_s7 + $0x38] sm:$0xff]  }
 0x21d   :  { %v1100_v40 = vmul.f32 %v1093_v31, %v1087_v36  ;;  %v3011_v31 = vld [vmem:[%s3665_s7 + $0x18] sm:$0xff]  }
 0x21e   :  { %v1101_v41 = vmul.f32 %v1097_v34, %v1088_v38  ;;  %v3014_v34 = vld [vmem:[%s3665_s7 + $0x30] sm:$0xff]  }
 0x21f   :  { %v3373_v42 = vadd.f32 %v1106_v37, %v1100_v40 }
 0x220   :  { %v3375_v43 = vadd.f32 %v1110_v39, %v1101_v41 }
 0x221   :  { %v1115_v44 = vpack.c.bf16 %v3373_v42, %v3373_v42 }
 0x222   :  { %v1116_v45 = vpack.c.bf16 %v3375_v43, %v3375_v43 }
 0x224   :  { %1341 = vmatprep.mubr.bf16.mxu1 %v1116_v45 }
 0x225   :  { %1342 = vmatmul.mubr.bf16.vlgmr.msra.gmra.mrb[0].mxu1 %v1115_v44 }
 0x226   :  { %1434 = vmatprep.mubr.f32.mxu1 %v3138_v46 }
 0x2f8   :  { %v3382_v47 = vpop.f32.mrb[0].mxu1 }
 0x2f9   :  { %v3384_v48 = vpop.f32.mrb[1].mxu1  ;;  %v1350_v51 = vmul.f32 %v3382_v47, %v3373_v42  ;;  %v1352_v56 = vmul.f32 %v3382_v47, %v3382_v47 }
 0x2fa   :  { %v1351_v49 = vmul.f32 %v3384_v48, %v3375_v43  ;;  %v1347_v50 = vpop.f32.mrb[2].mxu1  ;;  %v1353_v54 = vmul.f32 %v3384_v48, %v3384_v48 }
 0x2fb   :  { %v1348_v52 = vpop.f32.mrb[3].mxu1 }
 0x2fc   :  { %2526 = vmatprep.subr.msk.mxu1 %vm1041_vm0, %v1351_v49 }
 0x2fd   :  { %2527 = vmatpush1.msk.msra.mxu1 %vm1041_vm0, %v1350_v51 }
 0x2fe   :  { %2528 = vmatmul.mubr.msk.f32.vlgmr.msra.gmra.mrb[4].mxu1 %vm1354_vm1, %v3393_v53  ;;  %2529 = vmatprep.subr.msk.mxu1 %vm1041_vm0, %v1353_v54 }
 0x2ff   :  { %2530 = vmatpush1.msk.msra.mxu1 %vm1041_vm0, %v1352_v56  ;;  %1505 = vmatprep.mubr.f32.mxu1 %v3138_v46 }
 0x300   :  { %2594 = vmatprep.subr.bf16.mxu1 %v2992_v55 }
 0x302   :  { %2531 = vmatmul.mubr.msk.f32.vlgmr.msra.gmra.mrb[6].mxu1 %vm1354_vm1, %v3393_v53 }
 0x303   :  { %2595 = vmatpush3.bf16.msra.mxu1 %v2993_v57 }
 0x304   :  { %2596 = vmatprep.subr.bf16.mxu1 %v2994_v58 }
 0x307   :  { %2597 = vmatpush3.bf16.msra.mxu1 %v2995_v59 }
 0x308   :  { %2598 = vmatprep.subr.bf16.mxu1 %v2996_v60 }
 0x30b   :  { %2599 = vmatpush3.bf16.msra.mxu1 %v2997_v61 }
 0x30c   :  { %2600 = vmatprep.subr.bf16.mxu1 %v2998_v62 }
 0x30f   :  { %2601 = vmatpush3.bf16.msra.mxu1 %v2999_v63 }
 0x310   :  { %2602 = vmatprep.subr.bf16.mxu1 %v3000_v0 }
 0x313   :  { %2603 = vmatpush3.bf16.msra.mxu1 %v3001_v1  ;;  %v2548_v1 = vld [vmem:[%s3666_s8] ss:$0 sm:$0xff] }
 0x314   :  { %2604 = vmatprep.subr.bf16.mxu1 %v3002_v2 }
 0x317   :  { %2605 = vmatpush3.bf16.msra.mxu1 %v3003_v3  ;;  %v2549_v3 = vld [vmem:[%s3667_s9] ss:$0 sm:$0xff] }
 0x318   :  { %2606 = vmatprep.subr.bf16.mxu1 %v3004_v4 }
 0x31b   :  { %2607 = vmatpush3.bf16.msra.mxu1 %v3005_v5 }
 0x31c   :  { %2608 = vmatprep.subr.bf16.mxu1 %v3006_v6 }
 0x31f   :  { %2609 = vmatpush3.bf16.msra.mxu1 %v3007_v7 }
 0x320   :  { %2665 = vmatprep.subr.bf16.mxu1 %v3138_v46 }
 0x3d1   :  { %v1436_v8 = vpop.f32.mrb[4].mxu1 }
 0x3d2   :  { %v1438_v9 = vpop.f32.mrb[5].mxu1  ;;  %vm1512_vm2 = vcmp.lt.f32.partialorder %v1436_v8, 0.0 }
 0x3d3   :  { %vm1513_vm3 = vcmp.lt.f32.partialorder %v1438_v9, 0.0 }
 0x3d5   :  { %v1507_v10 = vpop.f32.mrb[6].mxu1 }
 0x3d6   :  { %v1514_v11 = vadd.f32 1e-06, %v1507_v10  ;;  %v1509_v12 = vpop.f32.mrb[7].mxu1 }
 0x3d7   :  { %v1515_v13 = vadd.f32 1e-06, %v1509_v12  ;;  %v3016_v12 = vld [vmem:[%s3668_s10] sm:$0xff]  }
 0x3d8   :  { %3052 = vrcp.f32 %v1514_v11 }
 0x3d9   :  { %3054 = vrcp.f32 %v1515_v13 }
 0x3e2   :  { %v3053_v14 = vpop.eup %3052 }
 0x3e3   :  { %v3055_v15 = vpop.eup %3054  ;;  %v1518_v16 = vmul.f32 %v3053_v14, %v1436_v8  ;;  %v3017_v14 = vld [vmem:[%s3668_s10 + $0x8] sm:$0xff]  }
 0x3e4   :  { %v1519_v17 = vmul.f32 %v3055_v15, %v1438_v9  ;;  %v3018_v15 = vld [vmem:[%s3668_s10 + $0x10] sm:$0xff]  }
 0x3e5   :  { %v1520_v18 = vsel %vm1512_vm2, %v1518_v16, 0.0  ;;  %v3020_v16 = vld [vmem:[%s3668_s10 + $0x20] sm:$0xff]  }
 0x3e6   :  { %v1521_v19 = vsel %vm1513_vm3, %v1519_v17, 0.0  ;;  %v1522_v20 = vmul.f32 0.8, %v1520_v18  ;;  %v3021_v17 = vld [vmem:[%s3668_s10 + $0x28] sm:$0xff]   ;;  %v3022_v18 = vld [vmem:[%s3668_s10 + $0x30] sm:$0xff]  }
 0x3e7   :  { %v1523_v21 = vmul.f32 0.8, %v1521_v19  ;;  %v3023_v19 = vld [vmem:[%s3668_s10 + $0x38] sm:$0xff]  }
 0x3e8   :  { %v1524_v22 = vmul.f32 %v1522_v20, %v3382_v47  ;;  %v3024_v20 = vld [vmem:[%s3669_s11 + $0x40] sm:$0xff]  }
 0x3e9   :  { %v1525_v23 = vmul.f32 %v1523_v21, %v3384_v48 }
 0x3ea   :  { %v1526_v24 = vsub.f32 %v3373_v42, %v1524_v22 }
 0x3eb   :  { %v1527_v25 = vsub.f32 %v3375_v43, %v1525_v23 }
 0x3ec   :  { %v1528_v27 = vpack.c.bf16 %v1526_v24, %v1526_v24 }
 0x3ed   :  { %v1529_v26 = vpack.c.bf16 %v1527_v25, %v1527_v25 }
 0x3ef   :  { %1690 = vmatprep.mubr.bf16.mxu1 %v1529_v26 }
 0x3f0   :  { %1691 = vmatmul.mubr.bf16.vlgmr.msra.gmra.mrb[8].mxu1 %v1528_v27 }
 0x3f1   :  { %2666 = vmatpush3.bf16.msra.mxu1 %v3008_v28  ;;  %2681 = vmatprep.mubr.msk.bf16.mxu1 %vm3139_vm4, %v3138_v46 }
 0x3f2   :  { %2667 = vmatprep.subr.bf16.mxu1 %v3138_v46 }
 0x3f5   :  { %2668 = vmatpush3.bf16.msra.mxu1 %v3009_v29 }
 0x3f6   :  { %2669 = vmatprep.subr.bf16.mxu1 %v3138_v46 }
 0x3f9   :  { %2670 = vmatpush3.bf16.msra.mxu1 %v3010_v30  ;;  %v3025_v30 = vld [vmem:[%s3669_s11] sm:$0xff]  }
 0x3fa   :  { %2671 = vmatprep.subr.bf16.mxu1 %v3138_v46 }
 0x3fd   :  { %2672 = vmatpush3.bf16.msra.mxu1 %v3011_v31 }
 0x3fe   :  { %2673 = vmatprep.subr.bf16.mxu1 %v3138_v46 }
 0x401   :  { %2674 = vmatpush3.bf16.msra.mxu1 %v3012_v32  ;;  %v3026_v32 = vld [vmem:[%s3669_s11 + $0x48] sm:$0xff]  }
 0x402   :  { %2675 = vmatprep.subr.bf16.mxu1 %v3138_v46 }
 0x405   :  { %2676 = vmatpush3.bf16.msra.mxu1 %v3013_v33 }
 0x406   :  { %2677 = vmatprep.subr.bf16.mxu1 %v3138_v46 }
 0x409   :  { %2678 = vmatpush3.bf16.msra.mxu1 %v3014_v34 }
 0x40a   :  { %2679 = vmatprep.subr.bf16.mxu1 %v3138_v46 }
 0x40d   :  { %2680 = vmatpush3.bf16.msra.mxu1 %v3015_v35 }
 0x4c3   :  { %v2610_v36 = vpop.f32.mrb[8].mxu1 }
 0x4c4   :  { %v2611_v37 = vpop.f32.mrb[9].mxu1 }
 0x4c5   :  { %v2612_v38 = vadd.f32 %v2611_v37, %v2610_v36  ;;  %v2613_v39 = vpop.f32.mrb[10].mxu1  ;;  %v3027_v36 = vld [vmem:[%s3669_s11 + $0x8] sm:$0xff]  }
 0x4c6   :  { %v2614_v40 = vpop.f32.mrb[11].mxu1  ;;  %v3028_v39 = vld [vmem:[%s3669_s11 + $0x50] sm:$0xff]  }
 0x4c7   :  { %v1700_v41 = vsel %vm1041_vm0, %v2612_v38, 0.0  ;;  %v1708_v42 = vmul.f32 %v2612_v38, %v2612_v38  ;;  %v3029_v40 = vld [vmem:[%s3669_s11 + $0x10] sm:$0xff]  }
 0x4c8   :  { %v1701_v43 = vrot.slane %v1700_v41, 4 }
 0x4c9   :  { %v1709_v45 = vsel %vm1041_vm0, %v1708_v42, 0.0  ;;  %v3031_v42 = vld [vmem:[%s3669_s11 + $0x18] sm:$0xff]  }
 0x4ca   :  { %v1702_v44 = vadd.f32 %v1701_v43, %v1700_v41  ;;  %v1710_v47 = vrot.slane %v1709_v45, 4  ;;  %v3030_v41 = vld [vmem:[%s3669_s11 + $0x58] sm:$0xff]   ;;  %v3032_v43 = vld [vmem:[%s3669_s11 + $0x60] sm:$0xff]  }
 0x4cc   :  { %v1703_v48 = vrot.slane %v1702_v44, 2  ;;  %v1711_v49 = vadd.f32 %v1710_v47, %v1709_v45  ;;  %v3033_v45 = vld [vmem:[%s3669_s11 + $0x20] sm:$0xff]   ;;  %v3035_v47 = vld [vmem:[%s3669_s11 + $0x28] sm:$0xff]  }
 0x4ce   :  { %v1704_v50 = vadd.f32 %v1703_v48, %v1702_v44  ;;  %v1712_v51 = vrot.slane %v1711_v49, 2  ;;  %v3034_v44 = vld [vmem:[%s3669_s11 + $0x68] sm:$0xff]   ;;  %v3036_v48 = vld [vmem:[%s3669_s11 + $0x70] sm:$0xff]  }
 0x4d0   :  { %v1705_v52 = vrot.slane %v1704_v50, 1  ;;  %v1713_v54 = vadd.f32 %v1712_v51, %v1711_v49  ;;  %v3037_v49 = vld [vmem:[%s3669_s11 + $0x30] sm:$0xff]  }
 0x4d2   :  { %v1706_v55 = vadd.f32 %v1705_v52, %v1704_v50  ;;  %v1714_v56 = vrot.slane %v1713_v54, 1  ;;  %v3038_v50 = vld [vmem:[%s3669_s11 + $0x78] sm:$0xff]  }
 0x4d4   :  { %v1707_v57 = vmul.f32 0.16666667, %v1706_v55  ;;  %v1715_v58 = vadd.f32 %v1714_v56, %v1713_v54  ;;  %v3039_v54 = vld [vmem:[%s3669_s11 + $0x38] sm:$0xff]   ;;  %v3040_v56 = vld [vmem:[%s3669_s11 + $0x80] sm:$0xff]  }
 0x4d6   :  { %v1716_v59 = vmul.f32 0.16666667, %v1715_v58  ;;  %v1717_v60 = vmul.f32 %v1707_v57, %v1707_v57  ;;  %v1719_v63 = vsub.f32 %v2612_v38, %v1707_v57  ;;  %v3041_v58 = vld [vmem:[%s3669_s11 + $0x88] sm:$0xff]  }
 0x4d8   :  { %v1718_v61 = vsub.f32 %v1716_v59, %v1717_v60  ;;  %v3042_v59 = vld [vmem:[%s3669_s11 + $0x90] sm:$0xff]   ;;  %v3043_v60 = vld [vmem:[%s3669_s11 + $0x98] sm:$0xff]  }
 0x4da   :  { %v1720_v62 = vadd.f32 1e-05, %v1718_v61  ;;  %v3044_v61 = vld [vmem:[%s3669_s11 + $0xa0] sm:$0xff]  }
 0x4dc   :  { %3056 = vrsqrt.f32 %v1720_v62  ;;  %v3045_v62 = vld [vmem:[%s3669_s11 + $0xa8] sm:$0xff]  }
 0x4e6   :  { %v3057_v0 = vpop.eup %3056 }
 0x4e7   :  { %v1722_v2 = vmul.f32 %v3057_v0, %v1719_v63  ;;  %v3046_v63 = vld [vmem:[%s3669_s11 + $0xb0] sm:$0xff]  }
 0x4e9   :  { %v1729_v4 = vmul.f32 %v2548_v1, %v1722_v2  ;;  %v3047_v2 = vld [vmem:[%s3669_s11 + $0xb8] sm:$0xff]  }
 0x4eb   :  { %v1736_v5 = vadd.f32 %v2549_v3, %v1729_v4 }
 0x4ed   :  { %v1737_v6 = vpack.c.bf16 %v1736_v5, %v1736_v5 }
 0x4ef   :  { %2682 = vmatmul.mubr.bf16.vlgmr.msra.gmra.mrb[12].mxu1 %v1737_v6 }
 0x4f0   :  { %1914 = vmatprep.mubr.f32.mxu1 %v3138_v46 }
 0x5c2   :  { %v1836_v7 = vpop.f32.mrb[12].mxu1 }
 0x5c3   :  { %v1842_v8 = vmul.f32 %v1836_v7, %v1736_v5  ;;  %v1843_v9 = vmul.f32 %v1836_v7, %v1836_v7  ;;  %v2683_v10 = vpop.f32.mrb[13].mxu1 }
 0x5c4   :  { %v1839_v11 = vpop.f32.mrb[14].mxu1 }
 0x5c5   :  { %v2684_v13 = vpop.f32.mrb[15].mxu1  ;;  %2558 = vmatprep.subr.msk.mxu1 %vm1041_vm0, %v1843_v9 }
 0x5c6   :  { %2559 = vmatpush1.msk.msra.mxu1 %vm1041_vm0, %v1842_v8 }
 0x5c7   :  { %2560 = vmatmul.mubr.msk.f32.vlgmr.msra.gmra.mrb[16].mxu1 %vm1354_vm1, %v3393_v53  ;;  %2685 = vmatprep.subr.bf16.mxu1 %v3138_v46  ;;  %v3019_v53 = vld [vmem:[%s3668_s10 + $0x18] sm:$0xff]  }
 0x5c8   :  { %2686 = vmatpush3.bf16.msra.mxu1 %v3016_v12  ;;  %2701 = vmatprep.mubr.msk.bf16.mxu1 %vm3139_vm4, %v3138_v46 }
 0x5c9   :  { %2687 = vmatprep.subr.bf16.mxu1 %v3138_v46 }
 0x5cc   :  { %2688 = vmatpush3.bf16.msra.mxu1 %v3017_v14 }
 0x5cd   :  { %2689 = vmatprep.subr.bf16.mxu1 %v3138_v46 }
 0x5d0   :  { %2690 = vmatpush3.bf16.msra.mxu1 %v3018_v15 }
 0x5d1   :  { %2691 = vmatprep.subr.bf16.mxu1 %v3138_v46 }
 0x5d4   :  { %2692 = vmatpush3.bf16.msra.mxu1 %v3019_v53 }
 0x5d5   :  { %2693 = vmatprep.subr.bf16.mxu1 %v3138_v46 }
 0x5d8   :  { %2694 = vmatpush3.bf16.msra.mxu1 %v3020_v16 }
 0x5d9   :  { %2695 = vmatprep.subr.bf16.mxu1 %v3138_v46 }
 0x5dc   :  { %2696 = vmatpush3.bf16.msra.mxu1 %v3021_v17 }
 0x5dd   :  { %2697 = vmatprep.subr.bf16.mxu1 %v3138_v46 }
 0x5e0   :  { %2698 = vmatpush3.bf16.msra.mxu1 %v3022_v18 }
 0x5e1   :  { %2699 = vmatprep.subr.bf16.mxu1 %v3138_v46 }
 0x5e4   :  { %2700 = vmatpush3.bf16.msra.mxu1 %v3023_v19 }
 0x5e5   :  { %2634 = vmatprep.subr.bf16.mxu1 %v3024_v20 }
 0x69a   :  { %v1916_v21 = vpop.f32.mrb[16].mxu1 }
 0x69b   :  { %v1918_v22 = vpop.f32.mrb[17].mxu1  ;;  %vm1921_vm5 = vcmp.lt.f32.partialorder %v1916_v21, 0.0 }
 0x69c   :  { %v1922_v23 = vadd.f32 1e-06, %v1918_v22 }
 0x69e   :  { %3058 = vrcp.f32 %v1922_v23 }
 0x6a8   :  { %v3059_v24 = vpop.eup %3058 }
 0x6a9   :  { %v1924_v25 = vmul.f32 %v3059_v24, %v1916_v21 }
 0x6ab   :  { %v1925_v26 = vsel %vm1921_vm5, %v1924_v25, 0.0 }
 0x6ac   :  { %v1926_v27 = vmul.f32 0.8, %v1925_v26 }
 0x6ae   :  { %v1927_v28 = vmul.f32 %v1926_v27, %v1836_v7 }
 0x6b0   :  { %v3544_v29 = vsub.f32 %v1736_v5, %v1927_v28 }
 0x6b2   :  { %v1929_v31 = vpack.c.bf16 %v3544_v29, %v3544_v29  ;;  %v2047_v33 = vrot.slane %v3544_v29, 1  ;;  %v2049_v34 = vrot.slane %v3544_v29, 3  ;;  %v2044_v51 = vrot.slane %v3544_v29, 2 }
 0x6b3   :  { %v2043_v52 = vsel %vm2042_vm7, %v3544_v29, 0.0  ;;  %v2052_v0 = vrot.slane %v3544_v29, 4 }
 0x6b4   :  { %2702 = vmatmul.mubr.bf16.vlgmr.msra.gmra.mrb[20].mxu1 %v1929_v31  ;;  %v2048_v35 = vsel %vm2042_vm7, %v2047_v33, 0.0  ;;  %v2046_v55 = vsel %vm2045_vm6, %v2044_v51, %v2043_v52  ;;  %v2051_v1 = vsel %vm2042_vm7, %v2044_v51, 0.0 }
 0x6b5   :  { %2635 = vmatpush3.bf16.msra.mxu1 %v3025_v30  ;;  %v2050_v37 = vsel %vm2045_vm6, %v2049_v34, %v2048_v35  ;;  %v2054_v57 = vpack.c.bf16 %v2046_v55, %v2046_v55  ;;  %v2053_v3 = vsel %vm2045_vm6, %v2052_v0, %v2051_v1 }
 0x6b6   :  { %2636 = vmatprep.subr.bf16.mxu1 %v3026_v32  ;;  %v2055_v38 = vpack.c.bf16 %v2050_v37, %v2050_v37  ;;  %v2056_v4 = vpack.c.bf16 %v2053_v3, %v2053_v3 }
 0x6b8   :  { %2288 = vmatprep.mubr.bf16.mxu1 %v2055_v38 }
 0x6b9   :  { %2637 = vmatpush3.bf16.msra.mxu1 %v3027_v36 }
 0x6ba   :  { %2638 = vmatprep.subr.bf16.mxu1 %v3028_v39 }
 0x6bd   :  { %2639 = vmatpush3.bf16.msra.mxu1 %v3029_v40 }
 0x6be   :  { %2640 = vmatprep.subr.bf16.mxu1 %v3030_v41 }
 0x6c1   :  { %2641 = vmatpush3.bf16.msra.mxu1 %v3031_v42 }
 0x6c2   :  { %2642 = vmatprep.subr.bf16.mxu1 %v3032_v43 }
 0x6c5   :  { %2643 = vmatpush3.bf16.msra.mxu1 %v3033_v45 }
 0x6c6   :  { %2644 = vmatprep.subr.bf16.mxu1 %v3034_v44 }
 0x6c9   :  { %2645 = vmatpush3.bf16.msra.mxu1 %v3035_v47 }
 0x6ca   :  { %2646 = vmatprep.subr.bf16.mxu1 %v3036_v48 }
 0x6cd   :  { %2647 = vmatpush3.bf16.msra.mxu1 %v3037_v49 }
 0x6ce   :  { %2648 = vmatprep.subr.bf16.mxu1 %v3038_v50 }
 0x6d1   :  { %2649 = vmatpush3.bf16.msra.mxu1 %v3039_v54 }
 0x6d2   :  { %2705 = vmatprep.subr.bf16.mxu1 %v3138_v46 }
 0x6d4   :  { %2289 = vmatmul.mubr.bf16.vlgmr.msra.gmra.mrb[24].mxu1 %v2054_v57 }
 0x6d5   :  { %2706 = vmatpush3.bf16.msra.mxu1 %v3040_v56  ;;  %2721 = vmatprep.mubr.msk.bf16.mxu1 %vm3139_vm4, %v3138_v46 }
 0x6d6   :  { %2707 = vmatprep.subr.bf16.mxu1 %v3138_v46 }
 0x6d9   :  { %2708 = vmatpush3.bf16.msra.mxu1 %v3041_v58 }
 0x6da   :  { %2709 = vmatprep.subr.bf16.mxu1 %v3138_v46 }
 0x6dd   :  { %2710 = vmatpush3.bf16.msra.mxu1 %v3042_v59 }
 0x6de   :  { %2711 = vmatprep.subr.bf16.mxu1 %v3138_v46 }
 0x6e1   :  { %2712 = vmatpush3.bf16.msra.mxu1 %v3043_v60 }
 0x6e2   :  { %2713 = vmatprep.subr.bf16.mxu1 %v3138_v46 }
 0x6e5   :  { %2714 = vmatpush3.bf16.msra.mxu1 %v3044_v61 }
 0x6e6   :  { %2715 = vmatprep.subr.bf16.mxu1 %v3138_v46 }
 0x6e9   :  { %2716 = vmatpush3.bf16.msra.mxu1 %v3045_v62 }
 0x6ea   :  { %2717 = vmatprep.subr.bf16.mxu1 %v3138_v46 }
 0x6ed   :  { %2718 = vmatpush3.bf16.msra.mxu1 %v3046_v63 }
 0x6ee   :  { %2719 = vmatprep.subr.bf16.mxu1 %v3138_v46  ;;  %v2569_v46 = vld [vmem:[%s3670_s12] ss:$0 sm:$0xff] }
 0x6f1   :  { %2720 = vmatpush3.bf16.msra.mxu1 %v3047_v2 }
 0x6f4   :  { %2722 = vmatmul.mubr.bf16.vlgmr.msra.gmra.mrb[28].mxu1 %v2056_v4 }
 0x787   :  { %v2028_v5 = vpop.f32.mrb[20].mxu1 }
 0x788   :  { %v2703_v6 = vpop.f32.mrb[21].mxu1  ;;  %v2034_v7 = vmul.f32 %v2028_v5, %v2028_v5 }
 0x789   :  { %v2031_v8 = vpop.f32.mrb[22].mxu1 }
 0x78a   :  { %v2704_v9 = vpop.f32.mrb[23].mxu1  ;;  %v2036_v10 = vsel %vm2035_vm8, %v2034_v7, 0.0 }
 0x78b   :  { %2037 = vadd.xlane.f32.xlu0 %v2036_v10 }
 0x7a7   :  { %v2650_v11 = vpop.f32.mrb[24].mxu1 }
 0x7a8   :  { %v2651_v12 = vpop.f32.mrb[25].mxu1 }
 0x7a9   :  { %v2652_v13 = vadd.f32 %v2651_v12, %v2650_v11  ;;  %v2653_v14 = vpop.f32.mrb[26].mxu1 }
 0x7aa   :  { %v2654_v15 = vpop.f32.mrb[27].mxu1 }
 0x7ab   :  { %v2291_v53 = vadd.f32 %v2652_v13, %v2569_v46 }
 0x7c7   :  { %v2330_v16 = vpop.f32.mrb[28].mxu1 }
 0x7c8   :  { %v2331_v17 = vadd.f32 %v2330_v16, %v2291_v53  ;;  %v2723_v18 = vpop.f32.mrb[29].mxu1 }
 0x7c9   :  { %v2333_v19 = vpop.f32.mrb[30].mxu1 }
 0x7ca   :  { %v2724_v20 = vpop.f32.mrb[31].mxu1  ;;  %2337 = vst.msk [vmem:[#allocation7] sm:$0x3] %vm2336_vm9, %v2331_v17 }
 0x7cb   :  { %3117 = shalt.err (!%p3114_p6)
}
 0x7cc   :  { %s3118_s3 = scalar_lea.hbm %s3672_s14, 32 }
 0x7cd   :  { %p3119_p7 = scmp.ne.s32.totalorder %s3672_s14, %s3118_s3  ;;  %p3122_p8 = scmp.lt.u32.totalorder %s3118_s3, %s3672_s14 }
 0x7cf   :  { %p3124_p9 = pnand %p3122_p8, %p3119_p7 }
 0x7d1   :  { %3127 = shalt.err (!%p3124_p9)
}
 0x7d2   :  { %2349 = dma.vmem_to_hbm [thread:$0]  %s2347_s18, 32, %s3672_s14, [#allocation4]  }
 0x818   :  { %v2038_v21 = vpop.xlane.xlu0 %2037 }
 0x819   :  { %3060 = vrsqrt.f32 %v2038_v21 }
 0x823   :  { %v3061_v22 = vpop.eup %3060 }
 0x824   :  { %v2040_v23 = vmul.f32 %v3061_v22, %v2028_v5 }
 0x826   :  { %2041 = vst.msk [vmem:[%s3671_s13] sm:$0x3f] %vm2035_vm8, %v2040_v23 }
 0x827   :  { %3132 = dma.done.wait [#allocation4], 32  }
 0x828   :  { %3133 = vsyncadd [#allocation4], 4294967264 }
 0x829   :  { %2355 = vsyncpa [#allocation3], 1 }
 0x82a   :  { %2356 = vsyncpa [#allocation6], 1 }
 0x82b   :  { %2357 = vsyncpa [#allocation4], 1 }

</bundles_post_ra>
